<compile_context>
chip_gen: v7x
topology: tpu7x:2x2x1
jax: 0.10.0
libtpu: 0.0.40
codegen_flags: <defaults>
</compile_context>

<pallas_src>
import jax
import jax.numpy as jnp
from jax.experimental import pallas as pl
from jax.experimental.pallas import tpu as pltpu

BN_EPS = 1e-5
LANE = 128      # feature-dim padding granularity
SUBLANE = 8     # batch-dim padding granularity


def _round_up(n, m):
    return ((n + m - 1) // m) * m


def _full_spec(shape):
    # single-block spec: the whole (small, padded) array lives in VMEM
    return pl.BlockSpec(shape, lambda: (0,) * len(shape))


def _pad_to(a, shape):
    return jnp.pad(a, [(0, t - s) for s, t in zip(a.shape, shape)])


# ---------------------------------------------------------------------------
# Static layer description (padded dims), matching VanillaAE's layer order:
# encoder blocks -> latent linear -> decoder blocks -> output linear.
# ---------------------------------------------------------------------------
def build_layer_defs(input_dim, hidden_dims, latent_dim):
    p_in = _round_up(input_dim, LANE)
    p_h = [_round_up(h, LANE) for h in hidden_dims]
    p_lat = _round_up(latent_dim, LANE)

    defs = []
    dims = [p_in] + p_h
    for i in range(len(hidden_dims)):                       # Linear+ReLU+BN
        defs.append({"in_f": dims[i], "out_f": dims[i + 1], "bn": True})
    defs.append({"in_f": p_h[-1], "out_f": p_lat, "bn": False})   # latent head
    ddims = [p_lat] + list(reversed(p_h))
    for i in range(len(hidden_dims)):                       # Linear+ReLU+BN
        defs.append({"in_f": ddims[i], "out_f": ddims[i + 1], "bn": True})
    defs.append({"in_f": p_h[0], "out_f": p_in, "bn": False})     # reconstruction
    return defs, p_in, p_lat


# ---------------------------------------------------------------------------
# Fused kernel: every layer computed on the whole (VMEM-resident) batch, with
# per-layer weights streamed HBM -> VMEM through a manual 2-slot double buffer.
# ---------------------------------------------------------------------------
def _make_fused_kernel(layer_defs, n_real, n_pad, latent_idx, max_in, max_out):
    n_layers = len(layer_defs)

    def kernel(*refs):
        it = iter(refs)
        x_ref = next(it)
        layers = []
        for ld in layer_defs:
            w_ref = next(it)
            b_ref = next(it)
            g_ref = next(it) if ld["bn"] else None
            be_ref = next(it) if ld["bn"] else None
            layers.append((w_ref, b_ref, g_ref, be_ref, ld))
        recons_ref = next(it)
        latents_ref = next(it)
        wbufs = (next(it), next(it))      # two VMEM weight slots (bf16)
        sem = next(it)                    # DMA semaphores, shape (2,)

        need_row_mask = n_real != n_pad   # statically skip mask when aligned
        if need_row_mask:
            row_mask = (jax.lax.broadcasted_iota(jnp.int32, (n_pad, 1), 0)
                        < n_real).astype(jnp.float32)
        inv_n = jnp.float32(1.0 / n_real)

        # ---- manual 2-deep weight streaming --------------------------------
        copies = [None] * n_layers

        def start_copy(l):
            w_ref, _, _, _, ld = layers[l]
            slot = l % 2
            full = (ld["in_f"] == max_in) and (ld["out_f"] == max_out)
            dst = wbufs[slot] if full else wbufs[slot].at[0:ld["in_f"],
                                                          0:ld["out_f"]]
            cp = pltpu.make_async_copy(w_ref, dst, sem.at[slot])
            cp.start()
            copies[l] = cp

        start_copy(0)                     # prime slot 0 with layer-0 weights

        h = x_ref[...]                    # (n_pad, p_in) f32
        for l in range(n_layers):
            _, b_ref, g_ref, be_ref, ld = layers[l]
            copies[l].wait()
            if l + 1 < n_layers:
                start_copy(l + 1)         # prefetch next layer into other slot
            slot = l % 2
            full = (ld["in_f"] == max_in) and (ld["out_f"] == max_out)
            w = wbufs[slot][...] if full else wbufs[slot][0:ld["in_f"],
                                                          0:ld["out_f"]]
            # bf16 x bf16 -> f32 on the MXU
            z = jnp.dot(h.astype(jnp.bfloat16), w,
                        preferred_element_type=jnp.float32) + b_ref[...]
            if ld["bn"]:
                z = jnp.maximum(z, 0.0)                      # ReLU
                if need_row_mask:
                    mean = jnp.sum(z * row_mask, axis=0, keepdims=True) * inv_n
                    diff = (z - mean) * row_mask
                else:
                    mean = jnp.sum(z, axis=0, keepdims=True) * inv_n
                    diff = z - mean
                var = jnp.sum(diff * diff, axis=0, keepdims=True) * inv_n
                scale = g_ref[...] * jax.lax.rsqrt(var + BN_EPS)
                shift = be_ref[...] - mean * scale
                h = z * scale + shift                        # folded BN FMA
            else:
                h = z
            if l == latent_idx:
                latents_ref[...] = h.astype(latents_ref.dtype)

        recons_ref[...] = h.astype(recons_ref.dtype)

    return kernel


# ---------------------------------------------------------------------------
# Parameter construction (deterministic, PyTorch-like init).
# weight: (in_features, out_features), bias: (1, out_features).
# ---------------------------------------------------------------------------
def _init_linear(key, in_f, out_f):
    kw, kb = jax.random.split(key)
    bound = 1.0 / jnp.sqrt(jnp.float32(in_f))
    w = jax.random.uniform(kw, (in_f, out_f), jnp.float32, -bound, bound)
    b = jax.random.uniform(kb, (1, out_f), jnp.float32, -bound, bound)
    return {"w": w, "b": b}


def _init_bn(out_f):
    return {"gamma": jnp.ones((1, out_f), jnp.float32),
            "beta": jnp.zeros((1, out_f), jnp.float32)}


def init_params(key, input_dim, hidden_dims, latent_dim):
    params = {"encoder": [], "decoder": []}
    keys = jax.random.split(key, 2 * len(hidden_dims) + 2)
    k_iter = iter(keys)

    dims = [input_dim] + list(hidden_dims)
    for i in range(len(hidden_dims)):
        lay = _init_linear(next(k_iter), dims[i], dims[i + 1])
        lay.update(_init_bn(dims[i + 1]))
        params["encoder"].append(lay)
    params["latent"] = _init_linear(next(k_iter), hidden_dims[-1], latent_dim)

    ddims = [latent_dim] + list(reversed(hidden_dims))
    for i in range(len(hidden_dims)):
        lay = _init_linear(next(k_iter), ddims[i], ddims[i + 1])
        lay.update(_init_bn(ddims[i + 1]))
        params["decoder"].append(lay)
    params["decoder_out"] = _init_linear(next(k_iter), hidden_dims[0], input_dim)
    return params


# ---------------------------------------------------------------------------
# Host-side padding: weights -> bf16 (lane-dense, zero-padded); b/gamma/beta
# stay f32.  Zero-padded feature lanes stay exactly zero through every stage.
# ---------------------------------------------------------------------------
def build_padded_params(params, layer_defs):
    raw = (list(params["encoder"]) + [params["latent"]]
           + list(params["decoder"]) + [params["decoder_out"]])
    flat = []
    for lay, ld in zip(raw, layer_defs):
        flat.append(_pad_to(lay["w"], (ld["in_f"], ld["out_f"])).astype(jnp.bfloat16))
        flat.append(_pad_to(lay["b"], (1, ld["out_f"])).astype(jnp.float32))
        if ld["bn"]:
            flat.append(_pad_to(lay["gamma"], (1, ld["out_f"])).astype(jnp.float32))
            flat.append(_pad_to(lay["beta"], (1, ld["out_f"])).astype(jnp.float32))
    return flat


# ---------------------------------------------------------------------------
# Fused forward: single pallas_call, whole batch resident, weights streamed.
# ---------------------------------------------------------------------------
def build_forward(input_dim, hidden_dims, latent_dim):
    layer_defs, p_in, p_lat = build_layer_defs(input_dim, hidden_dims, latent_dim)
    latent_idx = len(hidden_dims)
    max_in = max(d["in_f"] for d in layer_defs)
    max_out = max(d["out_f"] for d in layer_defs)

    # per-param spec kind, matching build_padded_params order: w, b (, g, be)
    flags = []
    for ld in layer_defs:
        flags += [True, False] + ([False, False] if ld["bn"] else [])

    def forward(flat_params, x):
        assert len(flat_params) == len(flags)
        n = x.shape[0]
        n_pad = _round_up(max(n, 1), SUBLANE)

        x_pad = jnp.zeros((n_pad, p_in), jnp.float32)
        x_pad = x_pad.at[:n, :input_dim].set(x.astype(jnp.float32))

        kernel = _make_fused_kernel(layer_defs, n, n_pad, latent_idx,
                                    max_in, max_out)

        in_specs = [_full_spec((n_pad, p_in))]
        for a, is_w in zip(flat_params, flags):
            in_specs.append(pl.BlockSpec(memory_space=pl.ANY) if is_w
                            else _full_spec(tuple(a.shape)))

        # VMEM budget: io blocks + weight double buffer + small vectors +
        # headroom for a few live whole-batch f32 activations.
        weight_bytes = sum(int(a.size) * a.dtype.itemsize
                           for a, is_w in zip(flat_params, flags) if is_w)
        small_bytes = sum(int(a.size) * a.dtype.itemsize
                          for a, is_w in zip(flat_params, flags) if not is_w)
        io_bytes = 4 * n_pad * (2 * p_in + p_lat)
        wbuf_bytes = 2 * max_in * max_out * 2
        act_bytes = 4 * n_pad * max(max_in, max_out) * 4
        need = wbuf_bytes + small_bytes + io_bytes + act_bytes + (2 << 20)
        vmem_limit = int(min(max(need, 32 << 20), 64 << 20))  # v7x-safe cap

        cost = pl.CostEstimate(
            flops=2 * n_pad * sum(d["in_f"] * d["out_f"] for d in layer_defs),
            transcendentals=sum(d["out_f"] for d in layer_defs if d["bn"]),
            bytes_accessed=int(weight_bytes + small_bytes + io_bytes),
        )

        recons_pad, latents_pad = pl.pallas_call(
            kernel,
            out_shape=(jax.ShapeDtypeStruct((n_pad, p_in), jnp.float32),
                       jax.ShapeDtypeStruct((n_pad, p_lat), jnp.float32)),
            in_specs=in_specs,
            out_specs=(_full_spec((n_pad, p_in)),
                       _full_spec((n_pad, p_lat))),
            scratch_shapes=[pltpu.VMEM((max_in, max_out), jnp.bfloat16),
                            pltpu.VMEM((max_in, max_out), jnp.bfloat16),
                            pltpu.SemaphoreType.DMA((2,))],
            compiler_params=pltpu.CompilerParams(vmem_limit_bytes=vmem_limit),
            cost_estimate=cost,
        )(x_pad, *flat_params)

        return {"recons": recons_pad[:n, :input_dim],
                "latents": latents_pad[:n, :latent_dim]}

    return jax.jit(forward)


# ---------------------------------------------------------------------------
# References.
# ---------------------------------------------------------------------------
def ref_forward(params, x):
    """Pure-f32 reference with exact PyTorch VanillaAE forward semantics."""
    def lrb(h, lay):
        z = jnp.maximum(h @ lay["w"] + lay["b"], 0.0)
        m = jnp.mean(z, axis=0, keepdims=True)
        v = jnp.mean((z - m) ** 2, axis=0, keepdims=True)
        return (z - m) / jnp.sqrt(v + BN_EPS) * lay["gamma"] + lay["beta"]

    h = x
    for lay in params["encoder"]:
        h = lrb(h, lay)
    latents = h @ params["latent"]["w"] + params["latent"]["b"]
    d = latents
    for lay in params["decoder"]:
        d = lrb(d, lay)
    recons = d @ params["decoder_out"]["w"] + params["decoder_out"]["b"]
    return {"recons": recons, "latents": latents}


def ref_forward_bf16(params, x):
    """Same forward with the kernel's numerics (bf16 matmul operands, f32 accum/BN)."""
    def dot(h, w):
        return jnp.dot(h.astype(jnp.bfloat16), w.astype(jnp.bfloat16),
                       preferred_element_type=jnp.float32)

    def lrb(h, lay):
        z = jnp.maximum(dot(h, lay["w"]) + lay["b"], 0.0)
        m = jnp.mean(z, axis=0, keepdims=True)
        v = jnp.mean((z - m) ** 2, axis=0, keepdims=True)
        scale = lay["gamma"] * jax.lax.rsqrt(v + BN_EPS)
        return z * scale + (lay["beta"] - m * scale)

    h = x.astype(jnp.float32)
    for lay in params["encoder"]:
        h = lrb(h, lay)
    latents = dot(h, params["latent"]["w"]) + params["latent"]["b"]
    d = latents
    for lay in params["decoder"]:
        d = lrb(d, lay)
    recons = dot(d, params["decoder_out"]["w"]) + params["decoder_out"]["b"]
    return {"recons": recons, "latents": latents}


# ---------------------------------------------------------------------------
if __name__ == "__main__":
    # small shapes consistent with the module (input_dim / hidden_dims /
    # latent_dim scaled down)
    BATCH = 16
    INPUT_DIM = 64
    HIDDEN_DIMS = [48, 32]
    LATENT_DIM = 16

    key = jax.random.PRNGKey(0)
    k_params, k_x = jax.random.split(key)
    params = init_params(k_params, INPUT_DIM, HIDDEN_DIMS, LATENT_DIM)
    x = jax.random.normal(k_x, (BATCH, INPUT_DIM), jnp.float32)

    layer_defs, _, _ = build_layer_defs(INPUT_DIM, HIDDEN_DIMS, LATENT_DIM)
    flat_params = build_padded_params(params, layer_defs)
    forward = build_forward(INPUT_DIM, HIDDEN_DIMS, LATENT_DIM)

    out = forward(flat_params, x)
    out = jax.tree_util.tree_map(jax.block_until_ready, out)

    assert out["recons"].shape == (BATCH, INPUT_DIM)
    assert out["latents"].shape == (BATCH, LATENT_DIM)

    # Tight check: equivalent-numerics JAX reference (bf16 matmuls, f32 BN).
    ref_k = ref_forward_bf16(params, x)
    # Loose sanity check vs. the exact f32 PyTorch-semantics reference; the
    # gap is bounded by bf16 weight/activation quantization over 6 layers.
    ref_f = ref_forward(params, x)
    for name in ("recons", "latents"):
        err_k = float(jnp.max(jnp.abs(out[name] - ref_k[name])))
        err_f = float(jnp.max(jnp.abs(out[name] - ref_f[name])))
        assert err_k < 5e-3, f"{name} mismatch vs bf16 reference: {err_k}"
        assert err_f < 2.5e-1, f"{name} mismatch vs f32 reference: {err_f}"

    print("KERNEL_OK")
</pallas_src>

<mosaic_0001>
module attributes {stable_mosaic.version = 11 : i64} {
  func.func @kernel(%arg0: memref<16x128xf32, #tpu.memory_space<vmem>>, %arg1: memref<128x128xbf16, #tpu.memory_space<any>>, %arg2: memref<1x128xf32, #tpu.memory_space<vmem>>, %arg3: memref<1x128xf32, #tpu.memory_space<vmem>>, %arg4: memref<1x128xf32, #tpu.memory_space<vmem>>, %arg5: memref<128x128xbf16, #tpu.memory_space<any>>, %arg6: memref<1x128xf32, #tpu.memory_space<vmem>>, %arg7: memref<1x128xf32, #tpu.memory_space<vmem>>, %arg8: memref<1x128xf32, #tpu.memory_space<vmem>>, %arg9: memref<128x128xbf16, #tpu.memory_space<any>>, %arg10: memref<1x128xf32, #tpu.memory_space<vmem>>, %arg11: memref<128x128xbf16, #tpu.memory_space<any>>, %arg12: memref<1x128xf32, #tpu.memory_space<vmem>>, %arg13: memref<1x128xf32, #tpu.memory_space<vmem>>, %arg14: memref<1x128xf32, #tpu.memory_space<vmem>>, %arg15: memref<128x128xbf16, #tpu.memory_space<any>>, %arg16: memref<1x128xf32, #tpu.memory_space<vmem>>, %arg17: memref<1x128xf32, #tpu.memory_space<vmem>>, %arg18: memref<1x128xf32, #tpu.memory_space<vmem>>, %arg19: memref<128x128xbf16, #tpu.memory_space<any>>, %arg20: memref<1x128xf32, #tpu.memory_space<vmem>>, %arg21: memref<16x128xf32, #tpu.memory_space<vmem>>, %arg22: memref<16x128xf32, #tpu.memory_space<vmem>>, %arg23: memref<128x128xbf16, #tpu.memory_space<vmem>>, %arg24: memref<128x128xbf16, #tpu.memory_space<vmem>>, %arg25: memref<2x!tpu.dma_semaphore, #tpu.memory_space<semaphore_mem>>) attributes {dimension_semantics = [], scalar_prefetch = 0 : i64, scratch_operands = 3 : i64, tpu.core_type = #tpu.core_type<tc>} {
    %c0_i32 = arith.constant 0 : i32
    %0 = tpu.memref_slice %arg25[%c0_i32] : memref<2x!tpu.dma_semaphore, #tpu.memory_space<semaphore_mem>> -> memref<1x!tpu.dma_semaphore, #tpu.memory_space<semaphore_mem>>
    %1 = tpu.memref_squeeze %0 : memref<1x!tpu.dma_semaphore, #tpu.memory_space<semaphore_mem>> -> memref<!tpu.dma_semaphore, #tpu.memory_space<semaphore_mem>>
    tpu.enqueue_dma source(%arg1 : memref<128x128xbf16, #tpu.memory_space<any>>) target(%arg23 : memref<128x128xbf16, #tpu.memory_space<vmem>>) target_semaphore(%1 : memref<!tpu.dma_semaphore, #tpu.memory_space<semaphore_mem>>)
    %c0 = arith.constant 0 : index
    %c0_0 = arith.constant 0 : index
    %2 = vector.load %arg0[%c0, %c0_0] : memref<16x128xf32, #tpu.memory_space<vmem>>, vector<16x128xf32>
    %c0_i32_1 = arith.constant 0 : i32
    %3 = tpu.memref_slice %arg25[%c0_i32_1] : memref<2x!tpu.dma_semaphore, #tpu.memory_space<semaphore_mem>> -> memref<1x!tpu.dma_semaphore, #tpu.memory_space<semaphore_mem>>
    %4 = tpu.memref_squeeze %3 : memref<1x!tpu.dma_semaphore, #tpu.memory_space<semaphore_mem>> -> memref<!tpu.dma_semaphore, #tpu.memory_space<semaphore_mem>>
    tpu.wait_dma2 semaphore(%4 : memref<!tpu.dma_semaphore, #tpu.memory_space<semaphore_mem>>) src(%arg1 : memref<128x128xbf16, #tpu.memory_space<any>>) dst(%arg23 : memref<128x128xbf16, #tpu.memory_space<vmem>>)
    %c1_i32 = arith.constant 1 : i32
    %5 = tpu.memref_slice %arg25[%c1_i32] : memref<2x!tpu.dma_semaphore, #tpu.memory_space<semaphore_mem>> -> memref<1x!tpu.dma_semaphore, #tpu.memory_space<semaphore_mem>>
    %6 = tpu.memref_squeeze %5 : memref<1x!tpu.dma_semaphore, #tpu.memory_space<semaphore_mem>> -> memref<!tpu.dma_semaphore, #tpu.memory_space<semaphore_mem>>
    tpu.enqueue_dma source(%arg5 : memref<128x128xbf16, #tpu.memory_space<any>>) target(%arg24 : memref<128x128xbf16, #tpu.memory_space<vmem>>) target_semaphore(%6 : memref<!tpu.dma_semaphore, #tpu.memory_space<semaphore_mem>>)
    %c0_2 = arith.constant 0 : index
    %c0_3 = arith.constant 0 : index
    %7 = vector.load %arg23[%c0_2, %c0_3] : memref<128x128xbf16, #tpu.memory_space<vmem>>, vector<128x128xbf16>
    %8 = arith.truncf %2 : vector<16x128xf32> to vector<16x128xbf16>
    %cst = arith.constant dense<0.000000e+00> : vector<16x128xf32>
    %9 = tpu.matmul %8, %7, %cst {dimension_numbers = #tpu.dot_dimension_numbers<[1], [0], [0], [1], [0, 0, 1, 1], [], []>} : vector<16x128xbf16>, vector<128x128xbf16>, vector<16x128xf32> -> vector<16x128xf32>
    %c0_4 = arith.constant 0 : index
    %c0_5 = arith.constant 0 : index
    %10 = vector.load %arg2[%c0_4, %c0_5] : memref<1x128xf32, #tpu.memory_space<vmem>>, vector<1x128xf32>
    %11 = vector.broadcast %10 : vector<1x128xf32> to vector<16x128xf32>
    %12 = arith.addf %9, %11 : vector<16x128xf32>
    %cst_6 = arith.constant 0.000000e+00 : f32
    %13 = vector.broadcast %cst_6 : f32 to vector<16x128xf32>
    %14 = arith.maximumf %12, %13 : vector<16x128xf32>
    %cst_7 = arith.constant dense<0.000000e+00> : vector<128xf32>
    %15 = vector.multi_reduction <add>, %14, %cst_7 [0] : vector<16x128xf32> to vector<128xf32>
    %16 = vector.shape_cast %15 : vector<128xf32> to vector<1x128xf32>
    %cst_8 = arith.constant 6.250000e-02 : f32
    %17 = vector.broadcast %cst_8 : f32 to vector<1x128xf32>
    %18 = arith.mulf %16, %17 : vector<1x128xf32>
    %19 = vector.broadcast %18 : vector<1x128xf32> to vector<16x128xf32>
    %20 = arith.subf %14, %19 : vector<16x128xf32>
    %21 = arith.mulf %20, %20 : vector<16x128xf32>
    %cst_9 = arith.constant dense<0.000000e+00> : vector<128xf32>
    %22 = vector.multi_reduction <add>, %21, %cst_9 [0] : vector<16x128xf32> to vector<128xf32>
    %23 = vector.shape_cast %22 : vector<128xf32> to vector<1x128xf32>
    %cst_10 = arith.constant 6.250000e-02 : f32
    %24 = vector.broadcast %cst_10 : f32 to vector<1x128xf32>
    %25 = arith.mulf %23, %24 : vector<1x128xf32>
    %c0_11 = arith.constant 0 : index
    %c0_12 = arith.constant 0 : index
    %26 = vector.load %arg3[%c0_11, %c0_12] : memref<1x128xf32, #tpu.memory_space<vmem>>, vector<1x128xf32>
    %cst_13 = arith.constant 9.99999974E-6 : f32
    %27 = vector.broadcast %cst_13 : f32 to vector<1x128xf32>
    %28 = arith.addf %25, %27 : vector<1x128xf32>
    %29 = math.rsqrt %28 : vector<1x128xf32>
    %30 = arith.mulf %26, %29 : vector<1x128xf32>
    %c0_14 = arith.constant 0 : index
    %c0_15 = arith.constant 0 : index
    %31 = vector.load %arg4[%c0_14, %c0_15] : memref<1x128xf32, #tpu.memory_space<vmem>>, vector<1x128xf32>
    %32 = arith.mulf %18, %30 : vector<1x128xf32>
    %33 = arith.subf %31, %32 : vector<1x128xf32>
    %34 = vector.broadcast %30 : vector<1x128xf32> to vector<16x128xf32>
    %35 = arith.mulf %14, %34 : vector<16x128xf32>
    %36 = vector.broadcast %33 : vector<1x128xf32> to vector<16x128xf32>
    %37 = arith.addf %35, %36 : vector<16x128xf32>
    %c1_i32_16 = arith.constant 1 : i32
    %38 = tpu.memref_slice %arg25[%c1_i32_16] : memref<2x!tpu.dma_semaphore, #tpu.memory_space<semaphore_mem>> -> memref<1x!tpu.dma_semaphore, #tpu.memory_space<semaphore_mem>>
    %39 = tpu.memref_squeeze %38 : memref<1x!tpu.dma_semaphore, #tpu.memory_space<semaphore_mem>> -> memref<!tpu.dma_semaphore, #tpu.memory_space<semaphore_mem>>
    tpu.wait_dma2 semaphore(%39 : memref<!tpu.dma_semaphore, #tpu.memory_space<semaphore_mem>>) src(%arg5 : memref<128x128xbf16, #tpu.memory_space<any>>) dst(%arg24 : memref<128x128xbf16, #tpu.memory_space<vmem>>)
    %c0_i32_17 = arith.constant 0 : i32
    %40 = tpu.memref_slice %arg25[%c0_i32_17] : memref<2x!tpu.dma_semaphore, #tpu.memory_space<semaphore_mem>> -> memref<1x!tpu.dma_semaphore, #tpu.memory_space<semaphore_mem>>
    %41 = tpu.memref_squeeze %40 : memref<1x!tpu.dma_semaphore, #tpu.memory_space<semaphore_mem>> -> memref<!tpu.dma_semaphore, #tpu.memory_space<semaphore_mem>>
    tpu.enqueue_dma source(%arg9 : memref<128x128xbf16, #tpu.memory_space<any>>) target(%arg23 : memref<128x128xbf16, #tpu.memory_space<vmem>>) target_semaphore(%41 : memref<!tpu.dma_semaphore, #tpu.memory_space<semaphore_mem>>)
    %c0_18 = arith.constant 0 : index
    %c0_19 = arith.constant 0 : index
    %42 = vector.load %arg24[%c0_18, %c0_19] : memref<128x128xbf16, #tpu.memory_space<vmem>>, vector<128x128xbf16>
    %43 = arith.truncf %37 : vector<16x128xf32> to vector<16x128xbf16>
    %cst_20 = arith.constant dense<0.000000e+00> : vector<16x128xf32>
    %44 = tpu.matmul %43, %42, %cst_20 {dimension_numbers = #tpu.dot_dimension_numbers<[1], [0], [0], [1], [0, 0, 1, 1], [], []>} : vector<16x128xbf16>, vector<128x128xbf16>, vector<16x128xf32> -> vector<16x128xf32>
    %c0_21 = arith.constant 0 : index
    %c0_22 = arith.constant 0 : index
    %45 = vector.load %arg6[%c0_21, %c0_22] : memref<1x128xf32, #tpu.memory_space<vmem>>, vector<1x128xf32>
    %46 = vector.broadcast %45 : vector<1x128xf32> to vector<16x128xf32>
    %47 = arith.addf %44, %46 : vector<16x128xf32>
    %cst_23 = arith.constant 0.000000e+00 : f32
    %48 = vector.broadcast %cst_23 : f32 to vector<16x128xf32>
    %49 = arith.maximumf %47, %48 : vector<16x128xf32>
    %cst_24 = arith.constant dense<0.000000e+00> : vector<128xf32>
    %50 = vector.multi_reduction <add>, %49, %cst_24 [0] : vector<16x128xf32> to vector<128xf32>
    %51 = vector.shape_cast %50 : vector<128xf32> to vector<1x128xf32>
    %cst_25 = arith.constant 6.250000e-02 : f32
    %52 = vector.broadcast %cst_25 : f32 to vector<1x128xf32>
    %53 = arith.mulf %51, %52 : vector<1x128xf32>
    %54 = vector.broadcast %53 : vector<1x128xf32> to vector<16x128xf32>
    %55 = arith.subf %49, %54 : vector<16x128xf32>
    %56 = arith.mulf %55, %55 : vector<16x128xf32>
    %cst_26 = arith.constant dense<0.000000e+00> : vector<128xf32>
    %57 = vector.multi_reduction <add>, %56, %cst_26 [0] : vector<16x128xf32> to vector<128xf32>
    %58 = vector.shape_cast %57 : vector<128xf32> to vector<1x128xf32>
    %cst_27 = arith.constant 6.250000e-02 : f32
    %59 = vector.broadcast %cst_27 : f32 to vector<1x128xf32>
    %60 = arith.mulf %58, %59 : vector<1x128xf32>
    %c0_28 = arith.constant 0 : index
    %c0_29 = arith.constant 0 : index
    %61 = vector.load %arg7[%c0_28, %c0_29] : memref<1x128xf32, #tpu.memory_space<vmem>>, vector<1x128xf32>
    %cst_30 = arith.constant 9.99999974E-6 : f32
    %62 = vector.broadcast %cst_30 : f32 to vector<1x128xf32>
    %63 = arith.addf %60, %62 : vector<1x128xf32>
    %64 = math.rsqrt %63 : vector<1x128xf32>
    %65 = arith.mulf %61, %64 : vector<1x128xf32>
    %c0_31 = arith.constant 0 : index
    %c0_32 = arith.constant 0 : index
    %66 = vector.load %arg8[%c0_31, %c0_32] : memref<1x128xf32, #tpu.memory_space<vmem>>, vector<1x128xf32>
    %67 = arith.mulf %53, %65 : vector<1x128xf32>
    %68 = arith.subf %66, %67 : vector<1x128xf32>
    %69 = vector.broadcast %65 : vector<1x128xf32> to vector<16x128xf32>
    %70 = arith.mulf %49, %69 : vector<16x128xf32>
    %71 = vector.broadcast %68 : vector<1x128xf32> to vector<16x128xf32>
    %72 = arith.addf %70, %71 : vector<16x128xf32>
    %c0_i32_33 = arith.constant 0 : i32
    %73 = tpu.memref_slice %arg25[%c0_i32_33] : memref<2x!tpu.dma_semaphore, #tpu.memory_space<semaphore_mem>> -> memref<1x!tpu.dma_semaphore, #tpu.memory_space<semaphore_mem>>
    %74 = tpu.memref_squeeze %73 : memref<1x!tpu.dma_semaphore, #tpu.memory_space<semaphore_mem>> -> memref<!tpu.dma_semaphore, #tpu.memory_space<semaphore_mem>>
    tpu.wait_dma2 semaphore(%74 : memref<!tpu.dma_semaphore, #tpu.memory_space<semaphore_mem>>) src(%arg9 : memref<128x128xbf16, #tpu.memory_space<any>>) dst(%arg23 : memref<128x128xbf16, #tpu.memory_space<vmem>>)
    %c1_i32_34 = arith.constant 1 : i32
    %75 = tpu.memref_slice %arg25[%c1_i32_34] : memref<2x!tpu.dma_semaphore, #tpu.memory_space<semaphore_mem>> -> memref<1x!tpu.dma_semaphore, #tpu.memory_space<semaphore_mem>>
    %76 = tpu.memref_squeeze %75 : memref<1x!tpu.dma_semaphore, #tpu.memory_space<semaphore_mem>> -> memref<!tpu.dma_semaphore, #tpu.memory_space<semaphore_mem>>
    tpu.enqueue_dma source(%arg11 : memref<128x128xbf16, #tpu.memory_space<any>>) target(%arg24 : memref<128x128xbf16, #tpu.memory_space<vmem>>) target_semaphore(%76 : memref<!tpu.dma_semaphore, #tpu.memory_space<semaphore_mem>>)
    %c0_35 = arith.constant 0 : index
    %c0_36 = arith.constant 0 : index
    %77 = vector.load %arg23[%c0_35, %c0_36] : memref<128x128xbf16, #tpu.memory_space<vmem>>, vector<128x128xbf16>
    %78 = arith.truncf %72 : vector<16x128xf32> to vector<16x128xbf16>
    %cst_37 = arith.constant dense<0.000000e+00> : vector<16x128xf32>
    %79 = tpu.matmul %78, %77, %cst_37 {dimension_numbers = #tpu.dot_dimension_numbers<[1], [0], [0], [1], [0, 0, 1, 1], [], []>} : vector<16x128xbf16>, vector<128x128xbf16>, vector<16x128xf32> -> vector<16x128xf32>
    %c0_38 = arith.constant 0 : index
    %c0_39 = arith.constant 0 : index
    %80 = vector.load %arg10[%c0_38, %c0_39] : memref<1x128xf32, #tpu.memory_space<vmem>>, vector<1x128xf32>
    %81 = vector.broadcast %80 : vector<1x128xf32> to vector<16x128xf32>
    %82 = arith.addf %79, %81 : vector<16x128xf32>
    %c0_40 = arith.constant 0 : index
    %c0_41 = arith.constant 0 : index
    %83 = vector.load %arg22[%c0_40, %c0_41] : memref<16x128xf32, #tpu.memory_space<vmem>>, vector<16x128xf32>
    tpu.vector_store %arg22[%c0_40, %c0_41], %82 {strides = array<i32>} : memref<16x128xf32, #tpu.memory_space<vmem>>, vector<16x128xf32>,
    %c1_i32_42 = arith.constant 1 : i32
    %84 = tpu.memref_slice %arg25[%c1_i32_42] : memref<2x!tpu.dma_semaphore, #tpu.memory_space<semaphore_mem>> -> memref<1x!tpu.dma_semaphore, #tpu.memory_space<semaphore_mem>>
    %85 = tpu.memref_squeeze %84 : memref<1x!tpu.dma_semaphore, #tpu.memory_space<semaphore_mem>> -> memref<!tpu.dma_semaphore, #tpu.memory_space<semaphore_mem>>
    tpu.wait_dma2 semaphore(%85 : memref<!tpu.dma_semaphore, #tpu.memory_space<semaphore_mem>>) src(%arg11 : memref<128x128xbf16, #tpu.memory_space<any>>) dst(%arg24 : memref<128x128xbf16, #tpu.memory_space<vmem>>)
    %c0_i32_43 = arith.constant 0 : i32
    %86 = tpu.memref_slice %arg25[%c0_i32_43] : memref<2x!tpu.dma_semaphore, #tpu.memory_space<semaphore_mem>> -> memref<1x!tpu.dma_semaphore, #tpu.memory_space<semaphore_mem>>
    %87 = tpu.memref_squeeze %86 : memref<1x!tpu.dma_semaphore, #tpu.memory_space<semaphore_mem>> -> memref<!tpu.dma_semaphore, #tpu.memory_space<semaphore_mem>>
    tpu.enqueue_dma source(%arg15 : memref<128x128xbf16, #tpu.memory_space<any>>) target(%arg23 : memref<128x128xbf16, #tpu.memory_space<vmem>>) target_semaphore(%87 : memref<!tpu.dma_semaphore, #tpu.memory_space<semaphore_mem>>)
    %c0_44 = arith.constant 0 : index
    %c0_45 = arith.constant 0 : index
    %88 = vector.load %arg24[%c0_44, %c0_45] : memref<128x128xbf16, #tpu.memory_space<vmem>>, vector<128x128xbf16>
    %89 = arith.truncf %82 : vector<16x128xf32> to vector<16x128xbf16>
    %cst_46 = arith.constant dense<0.000000e+00> : vector<16x128xf32>
    %90 = tpu.matmul %89, %88, %cst_46 {dimension_numbers = #tpu.dot_dimension_numbers<[1], [0], [0], [1], [0, 0, 1, 1], [], []>} : vector<16x128xbf16>, vector<128x128xbf16>, vector<16x128xf32> -> vector<16x128xf32>
    %c0_47 = arith.constant 0 : index
    %c0_48 = arith.constant 0 : index
    %91 = vector.load %arg12[%c0_47, %c0_48] : memref<1x128xf32, #tpu.memory_space<vmem>>, vector<1x128xf32>
    %92 = vector.broadcast %91 : vector<1x128xf32> to vector<16x128xf32>
    %93 = arith.addf %90, %92 : vector<16x128xf32>
    %cst_49 = arith.constant 0.000000e+00 : f32
    %94 = vector.broadcast %cst_49 : f32 to vector<16x128xf32>
    %95 = arith.maximumf %93, %94 : vector<16x128xf32>
    %cst_50 = arith.constant dense<0.000000e+00> : vector<128xf32>
    %96 = vector.multi_reduction <add>, %95, %cst_50 [0] : vector<16x128xf32> to vector<128xf32>
    %97 = vector.shape_cast %96 : vector<128xf32> to vector<1x128xf32>
    %cst_51 = arith.constant 6.250000e-02 : f32
    %98 = vector.broadcast %cst_51 : f32 to vector<1x128xf32>
    %99 = arith.mulf %97, %98 : vector<1x128xf32>
    %100 = vector.broadcast %99 : vector<1x128xf32> to vector<16x128xf32>
    %101 = arith.subf %95, %100 : vector<16x128xf32>
    %102 = arith.mulf %101, %101 : vector<16x128xf32>
    %cst_52 = arith.constant dense<0.000000e+00> : vector<128xf32>
    %103 = vector.multi_reduction <add>, %102, %cst_52 [0] : vector<16x128xf32> to vector<128xf32>
    %104 = vector.shape_cast %103 : vector<128xf32> to vector<1x128xf32>
    %cst_53 = arith.constant 6.250000e-02 : f32
    %105 = vector.broadcast %cst_53 : f32 to vector<1x128xf32>
    %106 = arith.mulf %104, %105 : vector<1x128xf32>
    %c0_54 = arith.constant 0 : index
    %c0_55 = arith.constant 0 : index
    %107 = vector.load %arg13[%c0_54, %c0_55] : memref<1x128xf32, #tpu.memory_space<vmem>>, vector<1x128xf32>
    %cst_56 = arith.constant 9.99999974E-6 : f32
    %108 = vector.broadcast %cst_56 : f32 to vector<1x128xf32>
    %109 = arith.addf %106, %108 : vector<1x128xf32>
    %110 = math.rsqrt %109 : vector<1x128xf32>
    %111 = arith.mulf %107, %110 : vector<1x128xf32>
    %c0_57 = arith.constant 0 : index
    %c0_58 = arith.constant 0 : index
    %112 = vector.load %arg14[%c0_57, %c0_58] : memref<1x128xf32, #tpu.memory_space<vmem>>, vector<1x128xf32>
    %113 = arith.mulf %99, %111 : vector<1x128xf32>
    %114 = arith.subf %112, %113 : vector<1x128xf32>
    %115 = vector.broadcast %111 : vector<1x128xf32> to vector<16x128xf32>
    %116 = arith.mulf %95, %115 : vector<16x128xf32>
    %117 = vector.broadcast %114 : vector<1x128xf32> to vector<16x128xf32>
    %118 = arith.addf %116, %117 : vector<16x128xf32>
    %c0_i32_59 = arith.constant 0 : i32
    %119 = tpu.memref_slice %arg25[%c0_i32_59] : memref<2x!tpu.dma_semaphore, #tpu.memory_space<semaphore_mem>> -> memref<1x!tpu.dma_semaphore, #tpu.memory_space<semaphore_mem>>
    %120 = tpu.memref_squeeze %119 : memref<1x!tpu.dma_semaphore, #tpu.memory_space<semaphore_mem>> -> memref<!tpu.dma_semaphore, #tpu.memory_space<semaphore_mem>>
    tpu.wait_dma2 semaphore(%120 : memref<!tpu.dma_semaphore, #tpu.memory_space<semaphore_mem>>) src(%arg15 : memref<128x128xbf16, #tpu.memory_space<any>>) dst(%arg23 : memref<128x128xbf16, #tpu.memory_space<vmem>>)
    %c1_i32_60 = arith.constant 1 : i32
    %121 = tpu.memref_slice %arg25[%c1_i32_60] : memref<2x!tpu.dma_semaphore, #tpu.memory_space<semaphore_mem>> -> memref<1x!tpu.dma_semaphore, #tpu.memory_space<semaphore_mem>>
    %122 = tpu.memref_squeeze %121 : memref<1x!tpu.dma_semaphore, #tpu.memory_space<semaphore_mem>> -> memref<!tpu.dma_semaphore, #tpu.memory_space<semaphore_mem>>
    tpu.enqueue_dma source(%arg19 : memref<128x128xbf16, #tpu.memory_space<any>>) target(%arg24 : memref<128x128xbf16, #tpu.memory_space<vmem>>) target_semaphore(%122 : memref<!tpu.dma_semaphore, #tpu.memory_space<semaphore_mem>>)
    %c0_61 = arith.constant 0 : index
    %c0_62 = arith.constant 0 : index
    %123 = vector.load %arg23[%c0_61, %c0_62] : memref<128x128xbf16, #tpu.memory_space<vmem>>, vector<128x128xbf16>
    %124 = arith.truncf %118 : vector<16x128xf32> to vector<16x128xbf16>
    %cst_63 = arith.constant dense<0.000000e+00> : vector<16x128xf32>
    %125 = tpu.matmul %124, %123, %cst_63 {dimension_numbers = #tpu.dot_dimension_numbers<[1], [0], [0], [1], [0, 0, 1, 1], [], []>} : vector<16x128xbf16>, vector<128x128xbf16>, vector<16x128xf32> -> vector<16x128xf32>
    %c0_64 = arith.constant 0 : index
    %c0_65 = arith.constant 0 : index
    %126 = vector.load %arg16[%c0_64, %c0_65] : memref<1x128xf32, #tpu.memory_space<vmem>>, vector<1x128xf32>
    %127 = vector.broadcast %126 : vector<1x128xf32> to vector<16x128xf32>
    %128 = arith.addf %125, %127 : vector<16x128xf32>
    %cst_66 = arith.constant 0.000000e+00 : f32
    %129 = vector.broadcast %cst_66 : f32 to vector<16x128xf32>
    %130 = arith.maximumf %128, %129 : vector<16x128xf32>
    %cst_67 = arith.constant dense<0.000000e+00> : vector<128xf32>
    %131 = vector.multi_reduction <add>, %130, %cst_67 [0] : vector<16x128xf32> to vector<128xf32>
    %132 = vector.shape_cast %131 : vector<128xf32> to vector<1x128xf32>
    %cst_68 = arith.constant 6.250000e-02 : f32
    %133 = vector.broadcast %cst_68 : f32 to vector<1x128xf32>
    %134 = arith.mulf %132, %133 : vector<1x128xf32>
    %135 = vector.broadcast %134 : vector<1x128xf32> to vector<16x128xf32>
    %136 = arith.subf %130, %135 : vector<16x128xf32>
    %137 = arith.mulf %136, %136 : vector<16x128xf32>
    %cst_69 = arith.constant dense<0.000000e+00> : vector<128xf32>
    %138 = vector.multi_reduction <add>, %137, %cst_69 [0] : vector<16x128xf32> to vector<128xf32>
    %139 = vector.shape_cast %138 : vector<128xf32> to vector<1x128xf32>
    %cst_70 = arith.constant 6.250000e-02 : f32
    %140 = vector.broadcast %cst_70 : f32 to vector<1x128xf32>
    %141 = arith.mulf %139, %140 : vector<1x128xf32>
    %c0_71 = arith.constant 0 : index
    %c0_72 = arith.constant 0 : index
    %142 = vector.load %arg17[%c0_71, %c0_72] : memref<1x128xf32, #tpu.memory_space<vmem>>, vector<1x128xf32>
    %cst_73 = arith.constant 9.99999974E-6 : f32
    %143 = vector.broadcast %cst_73 : f32 to vector<1x128xf32>
    %144 = arith.addf %141, %143 : vector<1x128xf32>
    %145 = math.rsqrt %144 : vector<1x128xf32>
    %146 = arith.mulf %142, %145 : vector<1x128xf32>
    %c0_74 = arith.constant 0 : index
    %c0_75 = arith.constant 0 : index
    %147 = vector.load %arg18[%c0_74, %c0_75] : memref<1x128xf32, #tpu.memory_space<vmem>>, vector<1x128xf32>
    %148 = arith.mulf %134, %146 : vector<1x128xf32>
    %149 = arith.subf %147, %148 : vector<1x128xf32>
    %150 = vector.broadcast %146 : vector<1x128xf32> to vector<16x128xf32>
    %151 = arith.mulf %130, %150 : vector<16x128xf32>
    %152 = vector.broadcast %149 : vector<1x128xf32> to vector<16x128xf32>
    %153 = arith.addf %151, %152 : vector<16x128xf32>
    %c1_i32_76 = arith.constant 1 : i32
    %154 = tpu.memref_slice %arg25[%c1_i32_76] : memref<2x!tpu.dma_semaphore, #tpu.memory_space<semaphore_mem>> -> memref<1x!tpu.dma_semaphore, #tpu.memory_space<semaphore_mem>>
    %155 = tpu.memref_squeeze %154 : memref<1x!tpu.dma_semaphore, #tpu.memory_space<semaphore_mem>> -> memref<!tpu.dma_semaphore, #tpu.memory_space<semaphore_mem>>
    tpu.wait_dma2 semaphore(%155 : memref<!tpu.dma_semaphore, #tpu.memory_space<semaphore_mem>>) src(%arg19 : memref<128x128xbf16, #tpu.memory_space<any>>) dst(%arg24 : memref<128x128xbf16, #tpu.memory_space<vmem>>)
    %c0_77 = arith.constant 0 : index
    %c0_78 = arith.constant 0 : index
    %156 = vector.load %arg24[%c0_77, %c0_78] : memref<128x128xbf16, #tpu.memory_space<vmem>>, vector<128x128xbf16>
    %157 = arith.truncf %153 : vector<16x128xf32> to vector<16x128xbf16>
    %cst_79 = arith.constant dense<0.000000e+00> : vector<16x128xf32>
    %158 = tpu.matmul %157, %156, %cst_79 {dimension_numbers = #tpu.dot_dimension_numbers<[1], [0], [0], [1], [0, 0, 1, 1], [], []>} : vector<16x128xbf16>, vector<128x128xbf16>, vector<16x128xf32> -> vector<16x128xf32>
    %c0_80 = arith.constant 0 : index
    %c0_81 = arith.constant 0 : index
    %159 = vector.load %arg20[%c0_80, %c0_81] : memref<1x128xf32, #tpu.memory_space<vmem>>, vector<1x128xf32>
    %160 = vector.broadcast %159 : vector<1x128xf32> to vector<16x128xf32>
    %161 = arith.addf %158, %160 : vector<16x128xf32>
    %c0_82 = arith.constant 0 : index
    %c0_83 = arith.constant 0 : index
    %162 = vector.load %arg21[%c0_82, %c0_83] : memref<16x128xf32, #tpu.memory_space<vmem>>, vector<16x128xf32>
    tpu.vector_store %arg21[%c0_82, %c0_83], %161 {strides = array<i32>} : memref<16x128xf32, #tpu.memory_space<vmem>>, vector<16x128xf32>,
    return
  }
}

</mosaic_0001>

<bundles_post_ra>
// kernel: forward.1
= control target key start
LH: loop header
LB: loop body
LE: loop exit
PB: predicated region body
PF: predicated region fallthrough
CT: control target
= control target key end

     0   :  { %s2166_s0 = inlined_call_operand.vmem [shape: f32[16,128], index: 0, kind: input, shape index: {}]   ;;  %s2167_s1 = inlined_call_operand.vmem [shape: bf16[128,128], index: 1, kind: input, shape index: {}]   ;;  %s2168_s2 = inlined_call_operand.vmem [shape: f32[1,128], index: 2, kind: input, shape index: {}]   ;;  %s2169_s3 = inlined_call_operand.hbm [shape: f32[1,128], index: 3, kind: input, shape index: {}]   ;;  %s2170_s4 = inlined_call_operand.hbm [shape: f32[1,128], index: 4, kind: input, shape index: {}]   ;;  %s2171_s5 = inlined_call_operand.hbm [shape: bf16[128,128], index: 5, kind: input, shape index: {}]   ;;  %s2172_s6 = inlined_call_operand.hbm [shape: f32[1,128], index: 6, kind: input, shape index: {}]   ;;  %s2173_s7 = inlined_call_operand.hbm [shape: f32[1,128], index: 7, kind: input, shape index: {}]   ;;  %s2174_s8 = inlined_call_operand.hbm [shape: f32[1,128], index: 8, kind: input, shape index: {}]   ;;  %s2175_s9 = inlined_call_operand.hbm [shape: bf16[128,128], index: 9, kind: input, shape index: {}]   ;;  %s2176_s10 = inlined_call_operand.hbm [shape: f32[1,128], index: 10, kind: input, shape index: {}]   ;;  %s2177_s11 = inlined_call_operand.hbm [shape: bf16[128,128], index: 11, kind: input, shape index: {}]   ;;  %s2178_s12 = inlined_call_operand.hbm [shape: f32[1,128], index: 12, kind: input, shape index: {}]   ;;  %s2179_s13 = inlined_call_operand.hbm [shape: f32[1,128], index: 13, kind: input, shape index: {}]   ;;  %s2180_s14 = inlined_call_operand.hbm [shape: f32[1,128], index: 14, kind: input, shape index: {}]   ;;  %s2181_s15 = inlined_call_operand.hbm [shape: bf16[128,128], index: 15, kind: input, shape index: {}]   ;;  %s2182_s16 = inlined_call_operand.hbm [shape: f32[1,128], index: 16, kind: input, shape index: {}]   ;;  %s2183_s17 = inlined_call_operand.hbm [shape: f32[1,128], index: 17, kind: input, shape index: {}]   ;;  %s2184_s18 = inlined_call_operand.hbm [shape: f32[1,128], index: 18, kind: input, shape index: {}]   ;;  %s2185_s19 = inlined_call_operand.vmem [shape: bf16[128,128], index: 19, kind: input, shape index: {}]   ;;  %s2186_s20 = inlined_call_operand.hbm [shape: f32[1,128], index: 20, kind: input, shape index: {}]   ;;  %s2187_s21 = inlined_call_operand.hbm [shape: f32[16,128], index: 21, kind: output, shape index: {0}]   ;;  %s2188_s22 = inlined_call_operand.hbm [shape: f32[16,128], index: 22, kind: output, shape index: {1}]  }
   0x1   :  { %2195 = sst [smem:[#allocation56_spill]] %s2166_s0 }
   0x2   :  { %2196 = sst [smem:[#allocation57_spill]] %s2167_s1 }
   0x3   :  { %2197 = sst [smem:[#allocation58_spill]] %s2168_s2 }
   0x4   :  { %2198 = sst [smem:[#allocation59_spill]] %s2169_s3 }
   0x5   :  { %2199 = sst [smem:[#allocation60_spill]] %s2170_s4 }
   0x6   :  { %2200 = sst [smem:[#allocation61_spill]] %s2171_s5 }
   0x7   :  { %2201 = sst [smem:[#allocation62_spill]] %s2172_s6 }
   0x8   :  { %28 = vsyncpa [#allocation6], 0 }
   0x9   :  { %29 = vsyncpa [#allocation9], 0 }
   0xa   :  { %30 = vsyncpa [#allocation12], 0 }
   0xb   :  { %31 = vsyncpa [#allocation15], 0 }
   0xc   :  { %32 = vsyncpa [#allocation18], 0 }
   0xd   :  { %33 = vsyncpa [#allocation21], 0 }
   0xe   :  { %34 = vsyncpa [#allocation24], 0 }
   0xf   :  { %35 = vsyncpa [#allocation7], 0 }
  0x10   :  { %36 = vsyncpa [#allocation28], 0  ;;  %s1637_s3 = smov [#allocation8]   ;;  %s1638_s29 = smov [#allocation11]  }
  0x11   :  { %s57_s28 = sshll.u32 %s1637_s3, 4  ;;  %s77_s30 = sshll.u32 %s1638_s29, 4  ;;  %s58_s28 = int_to_ptr.vmem [resolvable:$true] %s57_s28  ;;  %s78_s30 = int_to_ptr.vmem [resolvable:$true] %s77_s30 }
  0x12   :  { %s2202_s23 = sld [smem:[#allocation60_spill]] }
  0x18   :  { %s1189_s1 = scalar_lea.hbm %s2202_s23, 16 }
  0x19   :  { %p1190_p0 = scmp.ne.s32.totalorder %s2202_s23, %s1189_s1  ;;  %p1193_p1 = scmp.lt.u32.totalorder %s1189_s1, %s2202_s23 }
  0x1b   :  { %p1195_p2 = pnand %p1193_p1, %p1190_p0 }
  0x1d   :  { %1198 = shalt.err (!%p1195_p2)
}
  0x1e   :  { %s1199_s26 = scalar_lea.vmem %s58_s28, 16  ;;  %s1203_s2 = scalar_lea.vmem %s58_s28, 32 }
  0x1f   :  { %p1200_p3 = scmp.ne.s32.totalorder %s58_s28, %s1199_s26  ;;  %p1204_p4 = scmp.lt.s32.totalorder %s58_s28, %s58_s28 }
  0x20   :  { %p1205_p5 = scmp.lt.s32.totalorder %s1203_s2, %s1199_s26 }
  0x22   :  { %p1206_p6 = por %p1205_p5, %p1204_p4 }
  0x24   :  { %p1207_p7 = pnand %p1206_p6, %p1200_p3 }
  0x26   :  { %1210 = shalt.err (!%p1207_p7)
}
  0x27   :  { %60 = dma.hbm_to_vmem [thread:$0]  %s2202_s23, 16, %s58_s28, [#allocation9]  }
  0x28   :  { %s1211_s0 = scalar_lea.hbm %s2173_s7, 16 }
  0x29   :  { %p1212_p8 = scmp.ne.s32.totalorder %s2173_s7, %s1211_s0  ;;  %p1215_p9 = scmp.lt.u32.totalorder %s1211_s0, %s2173_s7 }
  0x2b   :  { %p1217_p10 = pnand %p1215_p9, %p1212_p8 }
  0x2d   :  { %1220 = shalt.err (!%p1217_p10)
}
  0x2e   :  { %s1221_s25 = scalar_lea.vmem %s78_s30, 16  ;;  %s1225_s26 = scalar_lea.vmem %s78_s30, 32 }
  0x2f   :  { %p1222_p11 = scmp.ne.s32.totalorder %s78_s30, %s1221_s25  ;;  %p1226_p12 = scmp.lt.s32.totalorder %s78_s30, %s78_s30 }
  0x30   :  { %p1227_p13 = scmp.lt.s32.totalorder %s1225_s26, %s1221_s25 }
  0x32   :  { %p1228_p0 = por %p1227_p13, %p1226_p12 }
  0x34   :  { %p1229_p1 = pnand %p1228_p0, %p1222_p11 }
  0x36   :  { %1232 = shalt.err (!%p1229_p1)
}
  0x37   :  { %80 = dma.hbm_to_vmem [thread:$0]  %s2173_s7, 16, %s78_s30, [#allocation12]  }
  0x38   :  { %s1639_s2 = smov [#allocation14]   ;;  %s1640_s3 = smov [#allocation17]  }
  0x39   :  { %s97_s27 = sshll.u32 %s1639_s2, 4  ;;  %s117_s29 = sshll.u32 %s1640_s3, 4  ;;  %s98_s27 = int_to_ptr.vmem [resolvable:$true] %s97_s27  ;;  %s118_s29 = int_to_ptr.vmem [resolvable:$true] %s117_s29 }
  0x3a   :  { %s1233_s5 = scalar_lea.hbm %s2176_s10, 16 }
  0x3b   :  { %p1234_p2 = scmp.ne.s32.totalorder %s2176_s10, %s1233_s5  ;;  %p1237_p3 = scmp.lt.u32.totalorder %s1233_s5, %s2176_s10 }
  0x3d   :  { %p1239_p4 = pnand %p1237_p3, %p1234_p2 }
  0x3f   :  { %1242 = shalt.err (!%p1239_p4)
}
  0x40   :  { %s1243_s7 = scalar_lea.vmem %s98_s27, 16  ;;  %s1247_s30 = scalar_lea.vmem %s98_s27, 32 }
  0x41   :  { %p1244_p5 = scmp.ne.s32.totalorder %s98_s27, %s1243_s7  ;;  %p1248_p6 = scmp.lt.s32.totalorder %s98_s27, %s98_s27 }
  0x42   :  { %p1249_p7 = scmp.lt.s32.totalorder %s1247_s30, %s1243_s7 }
  0x44   :  { %p1250_p8 = por %p1249_p7, %p1248_p6 }
  0x46   :  { %p1251_p9 = pnand %p1250_p8, %p1244_p5 }
  0x48   :  { %1254 = shalt.err (!%p1251_p9)
}
  0x49   :  { %100 = dma.hbm_to_vmem [thread:$0]  %s2176_s10, 16, %s98_s27, [#allocation15]  }
  0x4a   :  { %s1255_s3 = scalar_lea.hbm %s2179_s13, 16 }
  0x4b   :  { %p1256_p10 = scmp.ne.s32.totalorder %s2179_s13, %s1255_s3  ;;  %p1259_p11 = scmp.lt.u32.totalorder %s1255_s3, %s2179_s13 }
  0x4d   :  { %p1261_p12 = pnand %p1259_p11, %p1256_p10 }
  0x4f   :  { %1264 = shalt.err (!%p1261_p12)
}
  0x50   :  { %s1265_s24 = scalar_lea.vmem %s118_s29, 16  ;;  %s1269_s6 = scalar_lea.vmem %s118_s29, 32 }
  0x51   :  { %p1266_p13 = scmp.ne.s32.totalorder %s118_s29, %s1265_s24  ;;  %p1270_p0 = scmp.lt.s32.totalorder %s118_s29, %s118_s29 }
  0x52   :  { %p1271_p1 = scmp.lt.s32.totalorder %s1269_s6, %s1265_s24 }
  0x54   :  { %p1272_p2 = por %p1271_p1, %p1270_p0 }
  0x56   :  { %p1273_p3 = pnand %p1272_p2, %p1266_p13 }
  0x58   :  { %1276 = shalt.err (!%p1273_p3)
}
  0x59   :  { %120 = dma.hbm_to_vmem [thread:$0]  %s2179_s13, 16, %s118_s29, [#allocation18]  }
  0x5a   :  { %s1641_s25 = smov [#allocation20]   ;;  %s1642_s30 = smov [#allocation23]  }
  0x5b   :  { %s137_s7 = sshll.u32 %s1641_s25, 4  ;;  %s157_s26 = sshll.u32 %s1642_s30, 4  ;;  %s138_s7 = int_to_ptr.vmem [resolvable:$true] %s137_s7  ;;  %s158_s26 = int_to_ptr.vmem [resolvable:$true] %s157_s26 }
  0x5c   :  { %s1277_s2 = scalar_lea.hbm %s2182_s16, 16 }
  0x5d   :  { %p1278_p4 = scmp.ne.s32.totalorder %s2182_s16, %s1277_s2  ;;  %p1281_p5 = scmp.lt.u32.totalorder %s1277_s2, %s2182_s16 }
  0x5f   :  { %p1283_p6 = pnand %p1281_p5, %p1278_p4 }
  0x61   :  { %1286 = shalt.err (!%p1283_p6)
}
  0x62   :  { %s1287_s13 = scalar_lea.vmem %s138_s7, 16  ;;  %s1291_s29 = scalar_lea.vmem %s138_s7, 32 }
  0x63   :  { %p1288_p7 = scmp.ne.s32.totalorder %s138_s7, %s1287_s13  ;;  %p1292_p8 = scmp.lt.s32.totalorder %s138_s7, %s138_s7 }
  0x64   :  { %p1293_p9 = scmp.lt.s32.totalorder %s1291_s29, %s1287_s13 }
  0x66   :  { %p1294_p10 = por %p1293_p9, %p1292_p8 }
  0x68   :  { %p1295_p11 = pnand %p1294_p10, %p1288_p7 }
  0x6a   :  { %1298 = shalt.err (!%p1295_p11)
}
  0x6b   :  { %140 = dma.hbm_to_vmem [thread:$0]  %s2182_s16, 16, %s138_s7, [#allocation21]  }
  0x6c   :  { %s1299_s27 = scalar_lea.hbm %s2184_s18, 16 }
  0x6d   :  { %p1300_p12 = scmp.ne.s32.totalorder %s2184_s18, %s1299_s27  ;;  %p1303_p13 = scmp.lt.u32.totalorder %s1299_s27, %s2184_s18 }
  0x6f   :  { %p1305_p0 = pnand %p1303_p13, %p1300_p12 }
  0x71   :  { %1308 = shalt.err (!%p1305_p0)
}
  0x72   :  { %s1309_s2 = scalar_lea.vmem %s158_s26, 16  ;;  %s1313_s3 = scalar_lea.vmem %s158_s26, 32 }
  0x73   :  { %p1310_p1 = scmp.ne.s32.totalorder %s158_s26, %s1309_s2  ;;  %p1314_p2 = scmp.lt.s32.totalorder %s158_s26, %s158_s26 }
  0x74   :  { %p1315_p3 = scmp.lt.s32.totalorder %s1313_s3, %s1309_s2 }
  0x76   :  { %p1316_p4 = por %p1315_p3, %p1314_p2 }
  0x78   :  { %p1317_p5 = pnand %p1316_p4, %p1310_p1 }
  0x7a   :  { %1320 = shalt.err (!%p1317_p5)
}
  0x7b   :  { %160 = dma.hbm_to_vmem [thread:$0]  %s2184_s18, 16, %s158_s26, [#allocation24]  }
  0x7c   :  { %s1643_s4 = smov [#allocation5]   ;;  %s1644_s5 = smov [#allocation10]  }
  0x7d   :  { %s47_s0 = sshll.u32 %s1643_s4, 4  ;;  %s67_s13 = sshll.u32 %s1644_s5, 4  ;;  %s48_s0 = int_to_ptr.vmem [resolvable:$true] %s47_s0  ;;  %s68_s13 = int_to_ptr.vmem [resolvable:$true] %s67_s13 }
  0x7e   :  { %s2203_s24 = sld [smem:[#allocation59_spill]] }
  0x84   :  { %s1321_s6 = scalar_lea.hbm %s2203_s24, 16 }
  0x85   :  { %p1322_p6 = scmp.ne.s32.totalorder %s2203_s24, %s1321_s6  ;;  %p1325_p7 = scmp.lt.u32.totalorder %s1321_s6, %s2203_s24 }
  0x87   :  { %p1327_p8 = pnand %p1325_p7, %p1322_p6 }
  0x89   :  { %1330 = shalt.err (!%p1327_p8)
}
  0x8a   :  { %s1331_s18 = scalar_lea.vmem %s48_s0, 16  ;;  %s1335_s26 = scalar_lea.vmem %s48_s0, 32 }
  0x8b   :  { %p1332_p9 = scmp.ne.s32.totalorder %s48_s0, %s1331_s18  ;;  %p1336_p10 = scmp.lt.s32.totalorder %s48_s0, %s48_s0 }
  0x8c   :  { %p1337_p11 = scmp.lt.s32.totalorder %s1335_s26, %s1331_s18 }
  0x8e   :  { %p1338_p12 = por %p1337_p11, %p1336_p10 }
  0x90   :  { %p1339_p13 = pnand %p1338_p12, %p1332_p9 }
  0x92   :  { %1342 = shalt.err (!%p1339_p13)
}
  0x93   :  { %50 = dma.hbm_to_vmem [thread:$0]  %s2203_s24, 16, %s48_s0, [#allocation6]  }
  0x94   :  { %s2204_s16 = sld [smem:[#allocation62_spill]] }
  0x9a   :  { %s1343_s7 = scalar_lea.hbm %s2204_s16, 16 }
  0x9b   :  { %p1344_p0 = scmp.ne.s32.totalorder %s2204_s16, %s1343_s7  ;;  %p1347_p1 = scmp.lt.u32.totalorder %s1343_s7, %s2204_s16 }
  0x9d   :  { %p1349_p2 = pnand %p1347_p1, %p1344_p0 }
  0x9f   :  { %1352 = shalt.err (!%p1349_p2)
}
  0xa0   :  { %s1353_s6 = scalar_lea.vmem %s68_s13, 16  ;;  %s1357_s10 = scalar_lea.vmem %s68_s13, 32 }
  0xa1   :  { %p1354_p3 = scmp.ne.s32.totalorder %s68_s13, %s1353_s6  ;;  %p1358_p4 = scmp.lt.s32.totalorder %s68_s13, %s68_s13 }
  0xa2   :  { %p1359_p5 = scmp.lt.s32.totalorder %s1357_s10, %s1353_s6 }
  0xa4   :  { %p1360_p6 = por %p1359_p5, %p1358_p4 }
  0xa6   :  { %p1361_p7 = pnand %p1360_p6, %p1354_p3 }
  0xa8   :  { %1364 = shalt.err (!%p1361_p7)
}
  0xa9   :  { %70 = dma.hbm_to_vmem [thread:$0]  %s2204_s16, 16, %s68_s13, [#allocation9]  }
  0xaa   :  { %s1645_s27 = smov [#allocation13]   ;;  %s1646_s30 = smov [#allocation16]  }
  0xab   :  { %s87_s25 = sshll.u32 %s1645_s27, 4  ;;  %s107_s18 = sshll.u32 %s1646_s30, 4  ;;  %s88_s25 = int_to_ptr.vmem [resolvable:$true] %s87_s25  ;;  %s108_s18 = int_to_ptr.vmem [resolvable:$true] %s107_s18 }
  0xac   :  { %s1365_s23 = scalar_lea.hbm %s2174_s8, 16 }
  0xad   :  { %p1366_p8 = scmp.ne.s32.totalorder %s2174_s8, %s1365_s23  ;;  %p1369_p9 = scmp.lt.u32.totalorder %s1365_s23, %s2174_s8 }
  0xaf   :  { %p1371_p10 = pnand %p1369_p9, %p1366_p8 }
  0xb1   :  { %1374 = shalt.err (!%p1371_p10)
}
  0xb2   :  { %s1375_s13 = scalar_lea.vmem %s88_s25, 16  ;;  %s1379_s16 = scalar_lea.vmem %s88_s25, 32 }
  0xb3   :  { %p1376_p11 = scmp.ne.s32.totalorder %s88_s25, %s1375_s13  ;;  %p1380_p12 = scmp.lt.s32.totalorder %s88_s25, %s88_s25 }
  0xb4   :  { %p1381_p13 = scmp.lt.s32.totalorder %s1379_s16, %s1375_s13 }
  0xb6   :  { %p1382_p0 = por %p1381_p13, %p1380_p12 }
  0xb8   :  { %p1383_p1 = pnand %p1382_p0, %p1376_p11 }
  0xba   :  { %1386 = shalt.err (!%p1383_p1)
}
  0xbb   :  { %90 = dma.hbm_to_vmem [thread:$0]  %s2174_s8, 16, %s88_s25, [#allocation12]  }
  0xbc   :  { %s1387_s10 = scalar_lea.hbm %s2178_s12, 16 }
  0xbd   :  { %p1388_p2 = scmp.ne.s32.totalorder %s2178_s12, %s1387_s10  ;;  %p1391_p3 = scmp.lt.u32.totalorder %s1387_s10, %s2178_s12 }
  0xbf   :  { %p1393_p4 = pnand %p1391_p3, %p1388_p2 }
  0xc1   :  { %1396 = shalt.err (!%p1393_p4)
}
  0xc2   :  { %s1397_s26 = scalar_lea.vmem %s108_s18, 16  ;;  %s1401_s28 = scalar_lea.vmem %s108_s18, 32 }
  0xc3   :  { %p1398_p5 = scmp.ne.s32.totalorder %s108_s18, %s1397_s26  ;;  %p1402_p6 = scmp.lt.s32.totalorder %s108_s18, %s108_s18 }
  0xc4   :  { %p1403_p7 = scmp.lt.s32.totalorder %s1401_s28, %s1397_s26 }
  0xc6   :  { %p1404_p8 = por %p1403_p7, %p1402_p6 }
  0xc8   :  { %p1405_p9 = pnand %p1404_p8, %p1398_p5 }
  0xca   :  { %1408 = shalt.err (!%p1405_p9)
}
  0xcb   :  { %110 = dma.hbm_to_vmem [thread:$0]  %s2178_s12, 16, %s108_s18, [#allocation15]  }
  0xcc   :  { %s1647_s23 = smov [#allocation19]   ;;  %s1648_s3 = smov [#allocation22]  }
  0xcd   :  { %s127_s2 = sshll.u32 %s1647_s23, 4  ;;  %s147_s7 = sshll.u32 %s1648_s3, 4  ;;  %s128_s2 = int_to_ptr.vmem [resolvable:$true] %s127_s2  ;;  %s148_s7 = int_to_ptr.vmem [resolvable:$true] %s147_s7 }
  0xce   :  { %s1409_s16 = scalar_lea.hbm %s2180_s14, 16 }
  0xcf   :  { %p1410_p10 = scmp.ne.s32.totalorder %s2180_s14, %s1409_s16  ;;  %p1413_p11 = scmp.lt.u32.totalorder %s1409_s16, %s2180_s14 }
  0xd1   :  { %p1415_p12 = pnand %p1413_p11, %p1410_p10 }
  0xd3   :  { %1418 = shalt.err (!%p1415_p12)
}
  0xd4   :  { %s1419_s12 = scalar_lea.vmem %s128_s2, 16  ;;  %s1423_s18 = scalar_lea.vmem %s128_s2, 32 }
  0xd5   :  { %p1420_p13 = scmp.ne.s32.totalorder %s128_s2, %s1419_s12  ;;  %p1424_p0 = scmp.lt.s32.totalorder %s128_s2, %s128_s2 }
  0xd6   :  { %p1425_p1 = scmp.lt.s32.totalorder %s1423_s18, %s1419_s12 }
  0xd8   :  { %p1426_p2 = por %p1425_p1, %p1424_p0 }
  0xda   :  { %p1427_p3 = pnand %p1426_p2, %p1420_p13 }
  0xdc   :  { %1430 = shalt.err (!%p1427_p3)
}
  0xdd   :  { %130 = dma.hbm_to_vmem [thread:$0]  %s2180_s14, 16, %s128_s2, [#allocation18]  }
  0xde   :  { %s1431_s30 = scalar_lea.hbm %s2183_s17, 16 }
  0xdf   :  { %p1432_p4 = scmp.ne.s32.totalorder %s2183_s17, %s1431_s30  ;;  %p1435_p5 = scmp.lt.u32.totalorder %s1431_s30, %s2183_s17 }
  0xe1   :  { %p1437_p6 = pnand %p1435_p5, %p1432_p4 }
  0xe3   :  { %1440 = shalt.err (!%p1437_p6)
}
  0xe4   :  { %s1441_s23 = scalar_lea.vmem %s148_s7, 16  ;;  %s1445_s3 = scalar_lea.vmem %s148_s7, 32 }
  0xe5   :  { %p1442_p7 = scmp.ne.s32.totalorder %s148_s7, %s1441_s23  ;;  %p1446_p8 = scmp.lt.s32.totalorder %s148_s7, %s148_s7 }
  0xe6   :  { %p1447_p9 = scmp.lt.s32.totalorder %s1445_s3, %s1441_s23 }
  0xe8   :  { %p1448_p10 = por %p1447_p9, %p1446_p8 }
  0xea   :  { %p1449_p11 = pnand %p1448_p10, %p1442_p7 }
  0xec   :  { %1452 = shalt.err (!%p1449_p11)
}
  0xed   :  { %150 = dma.hbm_to_vmem [thread:$0]  %s2183_s17, 16, %s148_s7, [#allocation21]  }
  0xee   :  { %s1649_s4 = smov [#allocation25]   ;;  %s1453_s29 = scalar_lea.hbm %s2186_s20, 16 }
  0xef   :  { %s167_s13 = sshll.u32 %s1649_s4, 4  ;;  %p1454_p12 = scmp.ne.s32.totalorder %s2186_s20, %s1453_s29  ;;  %s168_s13 = int_to_ptr.vmem [resolvable:$true] %s167_s13 }
  0xf0   :  { %p1457_p13 = scmp.lt.u32.totalorder %s1453_s29, %s2186_s20 }
  0xf2   :  { %p1459_p0 = pnand %p1457_p13, %p1454_p12 }
  0xf4   :  { %1462 = shalt.err (!%p1459_p0)
}
  0xf5   :  { %s1463_s10 = scalar_lea.vmem %s168_s13, 16  ;;  %s1467_s17 = scalar_lea.vmem %s168_s13, 32 }
  0xf6   :  { %p1464_p1 = scmp.ne.s32.totalorder %s168_s13, %s1463_s10  ;;  %p1468_p2 = scmp.lt.s32.totalorder %s168_s13, %s168_s13 }
  0xf7   :  { %p1469_p3 = scmp.lt.s32.totalorder %s1467_s17, %s1463_s10 }
  0xf9   :  { %p1470_p4 = por %p1469_p3, %p1468_p2 }
  0xfb   :  { %p1471_p5 = pnand %p1470_p4, %p1464_p1 }
  0xfd   :  { %1474 = shalt.err (!%p1471_p5)
}
  0xfe   :  { %170 = dma.hbm_to_vmem [thread:$0]  %s2186_s20, 16, %s168_s13, [#allocation24]  }
  0xff   :  { %1607 = dma.done.wait [#allocation6], 16  }
 0x100   :  { %1608 = vsyncadd [#allocation6], 4294967280 }
 0x101   :  { %1609 = dma.done.wait [#allocation9], 32  }
 0x102   :  { %1610 = vsyncadd [#allocation9], 4294967264 }
 0x103   :  { %1611 = dma.done.wait [#allocation12], 32  }
 0x104   :  { %1612 = vsyncadd [#allocation12], 4294967264 }
 0x105   :  { %1613 = dma.done.wait [#allocation15], 32  }
 0x106   :  { %1614 = vsyncadd [#allocation15], 4294967264 }
 0x107   :  { %1615 = dma.done.wait [#allocation18], 32  }
 0x108   :  { %1616 = vsyncadd [#allocation18], 4294967264 }
 0x109   :  { %1617 = dma.done.wait [#allocation21], 32  }
 0x10a   :  { %1618 = vsyncadd [#allocation21], 4294967264 }
 0x10b   :  { %1619 = dma.done.wait [#allocation24], 32  }
 0x10c   :  { %1620 = vsyncadd [#allocation24], 4294967264  ;;  %s2205_s30 = sld [smem:[#allocation57_spill]] }
 0x112   :  { %v243_v0 = vld [vmem:[%s2205_s30] sm:$0xff]  ;;  %v245_v1 = vld [vmem:[%s2205_s30 + $0x8] sm:$0xff]  ;;  %v247_v2 = vld [vmem:[%s2205_s30 + $0x10] sm:$0xff] }
 0x113   :  { %244 = vst [vmem:[#allocation2] sm:$0xff] %v243_v0  ;;  %246 = vst [vmem:[#allocation2 + $0x8] sm:$0xff] %v245_v1  ;;  %v249_v3 = vld [vmem:[%s2205_s30 + $0x18] sm:$0xff]  ;;  %v251_v4 = vld [vmem:[%s2205_s30 + $0x20] sm:$0xff] }
 0x114   :  { %248 = vst [vmem:[#allocation2 + $0x10] sm:$0xff] %v247_v2  ;;  %v253_v5 = vld [vmem:[%s2205_s30 + $0x28] sm:$0xff]  ;;  %250 = vst [vmem:[#allocation2 + $0x18] sm:$0xff] %v249_v3  ;;  %v255_v6 = vld [vmem:[%s2205_s30 + $0x30] sm:$0xff] }
 0x115   :  { %252 = vst [vmem:[#allocation2 + $0x20] sm:$0xff] %v251_v4  ;;  %254 = vst [vmem:[#allocation2 + $0x28] sm:$0xff] %v253_v5  ;;  %v257_v7 = vld [vmem:[%s2205_s30 + $0x38] sm:$0xff] }
 0x116   :  { %256 = vst [vmem:[#allocation2 + $0x30] sm:$0xff] %v255_v6  ;;  %258 = vst [vmem:[#allocation2 + $0x38] sm:$0xff] %v257_v7 }
 0x117   :  { %266 = vsyncadd [#allocation4], 1024  ;;  %s2206_s12 = sld [smem:[#allocation56_spill]] }
 0x11d   :  { %v267_v8 = vld [vmem:[%s2206_s12] sm:$0xff]  ;;  %v268_v9 = vld [vmem:[%s2206_s12 + $0x8] sm:$0xff] }
 0x11e   :  { %1621 = dma.done.wait [#allocation4], 1024 }
 0x11f   :  { %1622 = vsyncadd [#allocation4], 4294966272  ;;  %v1650_v10 = vmov 0.0   ;;  %vm1651_vm0 = vmmov 0   ;;  %v285_v11 = vld [vmem:[#allocation2] sm:$0xff]  ;;  %v286_v12 = vld [vmem:[#allocation2 + $0x8] sm:$0xff]  ;;  %v293_v19 = vpack.c.bf16 %v268_v9, %v267_v8 }
 0x120   :  { %1040 = vmatprep.subr.bf16.mxu0 %v1650_v10  ;;  %1056 = vmatprep.mubr.msk.bf16.mxu0 %vm1651_vm0, %v1650_v10  ;;  %v287_v13 = vld [vmem:[#allocation2 + $0x10] sm:$0xff]  ;;  %v288_v14 = vld [vmem:[#allocation2 + $0x18] sm:$0xff]  ;;  %v289_v15 = vld [vmem:[#allocation2 + $0x20] sm:$0xff]  ;;  %s1652_s17 = smov [#allocation3]   ;;  %s2207_s27 = sld [smem:[#allocation61_spill]] }
 0x121   :  { %1041 = vmatpush3.bf16.msra.mxu0 %v285_v11  ;;  %v290_v16 = vld [vmem:[#allocation2 + $0x28] sm:$0xff]  ;;  %v291_v17 = vld [vmem:[#allocation2 + $0x30] sm:$0xff]  ;;  %v292_v18 = vld [vmem:[#allocation2 + $0x38] sm:$0xff]  ;;  %s281_s7 = sshll.u32 %s1652_s17, 4  ;;  %s1969_s7 = int_to_ptr.vmem [resolvable:$true] %s281_s7 }
 0x122   :  { %1042 = vmatprep.subr.bf16.mxu0 %v1650_v10 }
 0x125   :  { %1043 = vmatpush3.bf16.msra.mxu0 %v286_v12 }
 0x126   :  { %1044 = vmatprep.subr.bf16.mxu0 %v1650_v10  ;;  %s1475_s30 = scalar_lea.hbm %s2207_s27, 1024 }
 0x127   :  { %p1476_p6 = scmp.ne.s32.totalorder %s2207_s27, %s1475_s30  ;;  %p1479_p7 = scmp.lt.u32.totalorder %s1475_s30, %s2207_s27 }
 0x129   :  { %1045 = vmatpush3.bf16.msra.mxu0 %v287_v13  ;;  %p1481_p8 = pnand %p1479_p7, %p1476_p6 }
 0x12a   :  { %1046 = vmatprep.subr.bf16.mxu0 %v1650_v10 }
 0x12d   :  { %1047 = vmatpush3.bf16.msra.mxu0 %v288_v14 }
 0x12e   :  { %1048 = vmatprep.subr.bf16.mxu0 %v1650_v10 }
 0x131   :  { %1049 = vmatpush3.bf16.msra.mxu0 %v289_v15 }
 0x132   :  { %1050 = vmatprep.subr.bf16.mxu0 %v1650_v10 }
 0x135   :  { %1051 = vmatpush3.bf16.msra.mxu0 %v290_v16 }
 0x136   :  { %1052 = vmatprep.subr.bf16.mxu0 %v1650_v10 }
 0x139   :  { %1053 = vmatpush3.bf16.msra.mxu0 %v291_v17 }
 0x13a   :  { %1054 = vmatprep.subr.bf16.mxu0 %v1650_v10 }
 0x13d   :  { %1055 = vmatpush3.bf16.msra.mxu0 %v292_v18 }
 0x140   :  { %1057 = vmatmul.mubr.bf16.vlgmr.msra.gmra.mrb[0].mxu0 %v293_v19 }
 0x141   :  { %1484 = shalt.err (!%p1481_p8)  }
 0x142   :  { %s1485_s25 = scalar_lea.vmem %s1969_s7, 1024  ;;  %p1490_p10 = scmp.lt.s32.totalorder %s1969_s7, %s1969_s7 }
 0x143   :  { %p1486_p9 = scmp.ne.s32.totalorder %s1969_s7, %s1485_s25  ;;  %p1491_p11 = scmp.lt.s32.totalorder %s1485_s25, %s1485_s25 }
 0x145   :  { %p1492_p12 = por %p1491_p11, %p1490_p10 }
 0x147   :  { %p1984_p13 = pnand %p1492_p12, %p1486_p9 }
 0x149   :  { %1496 = shalt.err (!%p1984_p13)  }
 0x14a   :  { %284 = dma.hbm_to_vmem [thread:$0]  %s2207_s27, 1024, %s1969_s7, [#allocation4 + $0x1]  ;;  %v372_v50 = vlaneseq  ;;  %v364_v52 = vld [vmem:[#allocation5] sm:$0x1]  ;;  %v368_v56 = vld [vmem:[#allocation8] sm:$0x1] }
 0x14b   :  { %s2209_s13 = sld [smem:[#allocation58_spill]] }
 0x14c   :  { %v373_v51 = vshrl.u32 %v372_v50, 7 }
 0x14e   :  { %v1997_v53 = vsub.s32 0, %v373_v51 }
 0x151   :  { %v978_v20 = vld [vmem:[%s2209_s13] ss:$0 sm:$0xff] }
 0x213   :  { %v335_v21 = vpop.f32.mrb[0].mxu0 }
 0x214   :  { %v336_v22 = vadd.f32 %v978_v20, %v335_v21  ;;  %v1058_v23 = vpop.f32.mrb[1].mxu0 }
 0x215   :  { %v338_v24 = vpop.f32.mrb[2].mxu0 }
 0x216   :  { %v339_v25 = vadd.f32 %v978_v20, %v338_v24  ;;  %v1059_v26 = vpop.f32.mrb[3].mxu0  ;;  %v342_v27 = vmax.f32 %v336_v22, 0.0 }
 0x218   :  { %v343_v28 = vmax.f32 %v339_v25, 0.0 }
 0x21a   :  { %v344_v29 = vadd.f32 %v343_v28, %v342_v27 }
 0x21c   :  { %v345_v30 = vrot.slane %v344_v29, 4 }
 0x21e   :  { %v346_v31 = vadd.f32 %v345_v30, %v344_v29 }
 0x220   :  { %v347_v32 = vrot.slane %v346_v31, 2 }
 0x222   :  { %v348_v33 = vadd.f32 %v347_v32, %v346_v31 }
 0x224   :  { %v349_v34 = vrot.slane %v348_v33, 1 }
 0x226   :  { %v350_v35 = vadd.f32 %v349_v34, %v348_v33 }
 0x228   :  { %v351_v36 = vmul.f32 0.0625, %v350_v35 }
 0x22a   :  { %v352_v37 = vsub.f32 %v342_v27, %v351_v36  ;;  %v353_v38 = vsub.f32 %v343_v28, %v351_v36 }
 0x22c   :  { %v354_v39 = vmul.f32 %v352_v37, %v352_v37  ;;  %v355_v40 = vmul.f32 %v353_v38, %v353_v38 }
 0x22e   :  { %v356_v41 = vadd.f32 %v355_v40, %v354_v39 }
 0x230   :  { %v357_v42 = vrot.slane %v356_v41, 4 }
 0x232   :  { %v358_v43 = vadd.f32 %v357_v42, %v356_v41 }
 0x234   :  { %v359_v44 = vrot.slane %v358_v43, 2 }
 0x236   :  { %v360_v45 = vadd.f32 %v359_v44, %v358_v43 }
 0x238   :  { %v361_v46 = vrot.slane %v360_v45, 1 }
 0x23a   :  { %v362_v47 = vadd.f32 %v361_v46, %v360_v45 }
 0x23c   :  { %v363_v48 = vmul.f32 0.0625, %v362_v47 }
 0x23e   :  { %v365_v49 = vadd.f32 1e-05, %v363_v48 }
 0x240   :  { %1181 = vrsqrt.f32 %v365_v49 }
 0x24a   :  { %v1182_v54 = vpop.eup %1181 }
 0x24b   :  { %v367_v55 = vmul.f32 %v1182_v54, %v364_v52 }
 0x24d   :  { %v369_v57 = vmul.f32 %v367_v55, %v351_v36  ;;  %v375_v58 = vrot.slane %v367_v55, %v1997_v53 }
 0x24f   :  { %v370_v59 = vsub.f32 %v368_v56, %v369_v57  ;;  %v377_v60 = vmul.f32 %v375_v58, %v342_v27  ;;  %v378_v61 = vmul.f32 %v375_v58, %v343_v28 }
 0x251   :  { %v383_v62 = vrot.slane %v370_v59, %v1997_v53 }
 0x253   :  { %v385_v63 = vadd.f32 %v383_v62, %v377_v60  ;;  %v386_v0 = vadd.f32 %v383_v62, %v378_v61 }
 0x254   :  { %1623 = dma.done.wait [#allocation4 + $0x1], 1024 }
 0x255   :  { %1624 = vsyncadd [#allocation4 + $0x1], 4294966272  ;;  %1060 = vmatprep.subr.bf16.mxu1 %v1650_v10  ;;  %1076 = vmatprep.mubr.msk.bf16.mxu1 %vm1651_vm0, %v1650_v10  ;;  %v400_v1 = vld [vmem:[#allocation3] sm:$0xff]  ;;  %v401_v2 = vld [vmem:[#allocation3 + $0x8] sm:$0xff]  ;;  %v408_v9 = vpack.c.bf16 %v386_v0, %v385_v63  ;;  %s1653_s16 = smov [#allocation2]   ;;  %s1497_s6 = scalar_lea.hbm %s2175_s9, 1024 }
 0x256   :  { %1061 = vmatpush3.bf16.msra.mxu1 %v400_v1  ;;  %v402_v3 = vld [vmem:[#allocation3 + $0x10] sm:$0xff]  ;;  %v403_v4 = vld [vmem:[#allocation3 + $0x18] sm:$0xff]  ;;  %v404_v5 = vld [vmem:[#allocation3 + $0x20] sm:$0xff]  ;;  %s396_s5 = sshll.u32 %s1653_s16, 4  ;;  %p1498_p0 = scmp.ne.s32.totalorder %s2175_s9, %s1497_s6  ;;  %s2011_s5 = int_to_ptr.vmem [resolvable:$true] %s396_s5 }
 0x257   :  { %1062 = vmatprep.subr.bf16.mxu1 %v1650_v10  ;;  %v405_v6 = vld [vmem:[#allocation3 + $0x28] sm:$0xff]  ;;  %v406_v7 = vld [vmem:[#allocation3 + $0x30] sm:$0xff]  ;;  %v407_v8 = vld [vmem:[#allocation3 + $0x38] sm:$0xff]  ;;  %p1501_p1 = scmp.lt.u32.totalorder %s1497_s6, %s2175_s9 }
 0x259   :  { %p1503_p2 = pnand %p1501_p1, %p1498_p0 }
 0x25a   :  { %1063 = vmatpush3.bf16.msra.mxu1 %v401_v2 }
 0x25b   :  { %1064 = vmatprep.subr.bf16.mxu1 %v1650_v10 }
 0x25e   :  { %1065 = vmatpush3.bf16.msra.mxu1 %v402_v3 }
 0x25f   :  { %1066 = vmatprep.subr.bf16.mxu1 %v1650_v10 }
 0x262   :  { %1067 = vmatpush3.bf16.msra.mxu1 %v403_v4 }
 0x263   :  { %1068 = vmatprep.subr.bf16.mxu1 %v1650_v10 }
 0x266   :  { %1069 = vmatpush3.bf16.msra.mxu1 %v404_v5 }
 0x267   :  { %1070 = vmatprep.subr.bf16.mxu1 %v1650_v10 }
 0x26a   :  { %1071 = vmatpush3.bf16.msra.mxu1 %v405_v6 }
 0x26b   :  { %1072 = vmatprep.subr.bf16.mxu1 %v1650_v10 }
 0x26e   :  { %1073 = vmatpush3.bf16.msra.mxu1 %v406_v7 }
 0x26f   :  { %1074 = vmatprep.subr.bf16.mxu1 %v1650_v10 }
 0x272   :  { %1075 = vmatpush3.bf16.msra.mxu1 %v407_v8 }
 0x275   :  { %1077 = vmatmul.mubr.bf16.vlgmr.msra.gmra.mrb[0].mxu1 %v408_v9 }
 0x276   :  { %1506 = shalt.err (!%p1503_p2)  }
 0x277   :  { %s1507_s0 = scalar_lea.vmem %s2011_s5, 1024  ;;  %p1512_p4 = scmp.lt.s32.totalorder %s2011_s5, %s2011_s5 }
 0x278   :  { %p1508_p3 = scmp.ne.s32.totalorder %s2011_s5, %s1507_s0  ;;  %p1513_p5 = scmp.lt.s32.totalorder %s1507_s0, %s1507_s0 }
 0x27a   :  { %p1514_p6 = por %p1513_p5, %p1512_p4 }
 0x27c   :  { %p2026_p7 = pnand %p1514_p6, %p1508_p3 }
 0x27e   :  { %1518 = shalt.err (!%p2026_p7)  }
 0x27f   :  { %399 = dma.hbm_to_vmem [thread:$0]  %s2175_s9, 1024, %s2011_s5, [#allocation4]  ;;  %v979_v11 = vld [vmem:[#allocation10] ss:$0 sm:$0xff]  ;;  %v479_v41 = vld [vmem:[#allocation11] sm:$0x1] }
 0x280   :  { %v483_v44 = vld [vmem:[#allocation13] sm:$0x1] }
 0x348   :  { %v450_v12 = vpop.f32.mrb[0].mxu1 }
 0x349   :  { %v451_v13 = vadd.f32 %v979_v11, %v450_v12  ;;  %v1078_v14 = vpop.f32.mrb[1].mxu1 }
 0x34a   :  { %v453_v15 = vpop.f32.mrb[2].mxu1 }
 0x34b   :  { %v454_v16 = vadd.f32 %v979_v11, %v453_v15  ;;  %v1079_v17 = vpop.f32.mrb[3].mxu1  ;;  %v457_v18 = vmax.f32 %v451_v13, 0.0 }
 0x34d   :  { %v458_v19 = vmax.f32 %v454_v16, 0.0 }
 0x34f   :  { %v459_v20 = vadd.f32 %v458_v19, %v457_v18 }
 0x351   :  { %v460_v21 = vrot.slane %v459_v20, 4 }
 0x353   :  { %v461_v22 = vadd.f32 %v460_v21, %v459_v20 }
 0x355   :  { %v462_v23 = vrot.slane %v461_v22, 2 }
 0x357   :  { %v463_v24 = vadd.f32 %v462_v23, %v461_v22 }
 0x359   :  { %v464_v25 = vrot.slane %v463_v24, 1 }
 0x35b   :  { %v465_v26 = vadd.f32 %v464_v25, %v463_v24 }
 0x35d   :  { %v466_v27 = vmul.f32 0.0625, %v465_v26 }
 0x35f   :  { %v467_v28 = vsub.f32 %v457_v18, %v466_v27  ;;  %v468_v29 = vsub.f32 %v458_v19, %v466_v27 }
 0x361   :  { %v469_v30 = vmul.f32 %v467_v28, %v467_v28  ;;  %v470_v31 = vmul.f32 %v468_v29, %v468_v29 }
 0x363   :  { %v471_v32 = vadd.f32 %v470_v31, %v469_v30 }
 0x365   :  { %v472_v33 = vrot.slane %v471_v32, 4 }
 0x367   :  { %v473_v34 = vadd.f32 %v472_v33, %v471_v32 }
 0x369   :  { %v474_v35 = vrot.slane %v473_v34, 2 }
 0x36b   :  { %v475_v36 = vadd.f32 %v474_v35, %v473_v34 }
 0x36d   :  { %v476_v37 = vrot.slane %v475_v36, 1 }
 0x36f   :  { %v477_v38 = vadd.f32 %v476_v37, %v475_v36 }
 0x371   :  { %v478_v39 = vmul.f32 0.0625, %v477_v38 }
 0x373   :  { %v480_v40 = vadd.f32 1e-05, %v478_v39 }
 0x375   :  { %1183 = vrsqrt.f32 %v480_v40 }
 0x37f   :  { %v1184_v42 = vpop.eup %1183 }
 0x380   :  { %v482_v43 = vmul.f32 %v1184_v42, %v479_v41 }
 0x382   :  { %v484_v45 = vmul.f32 %v482_v43, %v466_v27  ;;  %v490_v46 = vrot.slane %v482_v43, %v1997_v53 }
 0x384   :  { %v485_v47 = vsub.f32 %v483_v44, %v484_v45  ;;  %v492_v48 = vmul.f32 %v490_v46, %v457_v18  ;;  %v493_v49 = vmul.f32 %v490_v46, %v458_v19 }
 0x386   :  { %v498_v50 = vrot.slane %v485_v47, %v1997_v53 }
 0x388   :  { %v500_v51 = vadd.f32 %v498_v50, %v492_v48  ;;  %v501_v52 = vadd.f32 %v498_v50, %v493_v49 }
 0x389   :  { %1625 = dma.done.wait [#allocation4], 1024 }
 0x38a   :  { %1626 = vsyncadd [#allocation4], 4294966272  ;;  %1080 = vmatprep.subr.bf16.mxu0 %v1650_v10  ;;  %1096 = vmatprep.mubr.msk.bf16.mxu0 %vm1651_vm0, %v1650_v10  ;;  %s1519_s20 = scalar_lea.hbm %s2177_s11, 1024 }
 0x38b   :  { %p1520_p8 = scmp.ne.s32.totalorder %s2177_s11, %s1519_s20  ;;  %p1523_p9 = scmp.lt.u32.totalorder %s1519_s20, %s2177_s11 }
 0x38d   :  { %p1525_p10 = pnand %p1523_p9, %p1520_p8 }
 0x38f   :  { %1528 = shalt.err (!%p1525_p10)  }
 0x390   :  { %1540 = shalt.err (!%p1984_p13)  }
 0x391   :  { %514 = dma.hbm_to_vmem [thread:$0]  %s2177_s11, 1024, %s1969_s7, [#allocation4 + $0x1]  ;;  %v515_v54 = vld [vmem:[#allocation2] sm:$0xff]  ;;  %v516_v55 = vld [vmem:[#allocation2 + $0x8] sm:$0xff]  ;;  %v517_v56 = vld [vmem:[#allocation2 + $0x10] sm:$0xff]  ;;  %v523_v62 = vpack.c.bf16 %v501_v52, %v500_v51 }
 0x392   :  { %1081 = vmatpush3.bf16.msra.mxu0 %v515_v54  ;;  %v518_v57 = vld [vmem:[#allocation2 + $0x18] sm:$0xff]  ;;  %v519_v58 = vld [vmem:[#allocation2 + $0x20] sm:$0xff]  ;;  %v520_v59 = vld [vmem:[#allocation2 + $0x28] sm:$0xff] }
 0x393   :  { %1082 = vmatprep.subr.bf16.mxu0 %v1650_v10  ;;  %v521_v60 = vld [vmem:[#allocation2 + $0x30] sm:$0xff]  ;;  %v522_v61 = vld [vmem:[#allocation2 + $0x38] sm:$0xff]  ;;  %v980_v63 = vld [vmem:[#allocation14] ss:$0 sm:$0xff] }
 0x396   :  { %1083 = vmatpush3.bf16.msra.mxu0 %v516_v55 }
 0x397   :  { %1084 = vmatprep.subr.bf16.mxu0 %v1650_v10 }
 0x39a   :  { %1085 = vmatpush3.bf16.msra.mxu0 %v517_v56 }
 0x39b   :  { %1086 = vmatprep.subr.bf16.mxu0 %v1650_v10 }
 0x39e   :  { %1087 = vmatpush3.bf16.msra.mxu0 %v518_v57 }
 0x39f   :  { %1088 = vmatprep.subr.bf16.mxu0 %v1650_v10 }
 0x3a2   :  { %1089 = vmatpush3.bf16.msra.mxu0 %v519_v58 }
 0x3a3   :  { %1090 = vmatprep.subr.bf16.mxu0 %v1650_v10 }
 0x3a6   :  { %1091 = vmatpush3.bf16.msra.mxu0 %v520_v59 }
 0x3a7   :  { %1092 = vmatprep.subr.bf16.mxu0 %v1650_v10 }
 0x3aa   :  { %1093 = vmatpush3.bf16.msra.mxu0 %v521_v60 }
 0x3ab   :  { %1094 = vmatprep.subr.bf16.mxu0 %v1650_v10 }
 0x3ae   :  { %1095 = vmatpush3.bf16.msra.mxu0 %v522_v61 }
 0x3b1   :  { %1097 = vmatmul.mubr.bf16.vlgmr.msra.gmra.mrb[4].mxu0 %v523_v62 }
 0x484   :  { %v565_v0 = vpop.f32.mrb[4].mxu0 }
 0x485   :  { %v566_v1 = vadd.f32 %v980_v63, %v565_v0  ;;  %v1098_v2 = vpop.f32.mrb[5].mxu0 }
 0x486   :  { %v568_v3 = vpop.f32.mrb[6].mxu0 }
 0x487   :  { %572 = vst [vmem:[#allocation27] sm:$0xff] %v566_v1  ;;  %v569_v4 = vadd.f32 %v980_v63, %v568_v3  ;;  %v1099_v5 = vpop.f32.mrb[7].mxu0 }
 0x489   :  { %573 = vst [vmem:[#allocation27 + $0x8] sm:$0xff] %v569_v4 }
 0x48a   :  { %1627 = dma.done.wait [#allocation4 + $0x1], 1024 }
 0x48b   :  { %1628 = vsyncadd [#allocation4 + $0x1], 4294966272  ;;  %1100 = vmatprep.subr.bf16.mxu1 %v1650_v10  ;;  %1116 = vmatprep.mubr.msk.bf16.mxu1 %vm1651_vm0, %v1650_v10  ;;  %s1541_s23 = scalar_lea.hbm %s2181_s15, 1024 }
 0x48c   :  { %p1542_p11 = scmp.ne.s32.totalorder %s2181_s15, %s1541_s23  ;;  %p1545_p12 = scmp.lt.u32.totalorder %s1541_s23, %s2181_s15 }
 0x48e   :  { %p1547_p13 = pnand %p1545_p12, %p1542_p11 }
 0x490   :  { %1550 = shalt.err (!%p1547_p13)  }
 0x491   :  { %1562 = shalt.err (!%p2026_p7)  }
 0x492   :  { %586 = dma.hbm_to_vmem [thread:$0]  %s2181_s15, 1024, %s2011_s5, [#allocation4]  ;;  %v587_v6 = vld [vmem:[#allocation3] sm:$0xff]  ;;  %v588_v7 = vld [vmem:[#allocation3 + $0x8] sm:$0xff]  ;;  %v589_v8 = vld [vmem:[#allocation3 + $0x10] sm:$0xff]  ;;  %v595_v15 = vpack.c.bf16 %v569_v4, %v566_v1 }
 0x493   :  { %1101 = vmatpush3.bf16.msra.mxu1 %v587_v6  ;;  %v590_v9 = vld [vmem:[#allocation3 + $0x18] sm:$0xff]  ;;  %v591_v11 = vld [vmem:[#allocation3 + $0x20] sm:$0xff]  ;;  %v592_v12 = vld [vmem:[#allocation3 + $0x28] sm:$0xff] }
 0x494   :  { %1102 = vmatprep.subr.bf16.mxu1 %v1650_v10  ;;  %v593_v13 = vld [vmem:[#allocation3 + $0x30] sm:$0xff]  ;;  %v594_v14 = vld [vmem:[#allocation3 + $0x38] sm:$0xff]  ;;  %v981_v16 = vld [vmem:[#allocation16] ss:$0 sm:$0xff] }
 0x495   :  { %v666_v46 = vld [vmem:[#allocation17] sm:$0x1]  ;;  %v670_v49 = vld [vmem:[#allocation19] sm:$0x1] }
 0x497   :  { %1103 = vmatpush3.bf16.msra.mxu1 %v588_v7 }
 0x498   :  { %1104 = vmatprep.subr.bf16.mxu1 %v1650_v10 }
 0x49b   :  { %1105 = vmatpush3.bf16.msra.mxu1 %v589_v8 }
 0x49c   :  { %1106 = vmatprep.subr.bf16.mxu1 %v1650_v10 }
 0x49f   :  { %1107 = vmatpush3.bf16.msra.mxu1 %v590_v9 }
 0x4a0   :  { %1108 = vmatprep.subr.bf16.mxu1 %v1650_v10 }
 0x4a3   :  { %1109 = vmatpush3.bf16.msra.mxu1 %v591_v11 }
 0x4a4   :  { %1110 = vmatprep.subr.bf16.mxu1 %v1650_v10 }
 0x4a7   :  { %1111 = vmatpush3.bf16.msra.mxu1 %v592_v12 }
 0x4a8   :  { %1112 = vmatprep.subr.bf16.mxu1 %v1650_v10 }
 0x4ab   :  { %1113 = vmatpush3.bf16.msra.mxu1 %v593_v13 }
 0x4ac   :  { %1114 = vmatprep.subr.bf16.mxu1 %v1650_v10 }
 0x4af   :  { %1115 = vmatpush3.bf16.msra.mxu1 %v594_v14 }
 0x4b2   :  { %1117 = vmatmul.mubr.bf16.vlgmr.msra.gmra.mrb[4].mxu1 %v595_v15 }
 0x585   :  { %v637_v17 = vpop.f32.mrb[4].mxu1 }
 0x586   :  { %v638_v18 = vadd.f32 %v981_v16, %v637_v17  ;;  %v1118_v19 = vpop.f32.mrb[5].mxu1 }
 0x587   :  { %v640_v20 = vpop.f32.mrb[6].mxu1 }
 0x588   :  { %v641_v21 = vadd.f32 %v981_v16, %v640_v20  ;;  %v1119_v22 = vpop.f32.mrb[7].mxu1  ;;  %v644_v23 = vmax.f32 %v638_v18, 0.0 }
 0x58a   :  { %v645_v24 = vmax.f32 %v641_v21, 0.0 }
 0x58c   :  { %v646_v25 = vadd.f32 %v645_v24, %v644_v23 }
 0x58e   :  { %v647_v26 = vrot.slane %v646_v25, 4 }
 0x590   :  { %v648_v27 = vadd.f32 %v647_v26, %v646_v25 }
 0x592   :  { %v649_v28 = vrot.slane %v648_v27, 2 }
 0x594   :  { %v650_v29 = vadd.f32 %v649_v28, %v648_v27 }
 0x596   :  { %v651_v30 = vrot.slane %v650_v29, 1 }
 0x598   :  { %v652_v31 = vadd.f32 %v651_v30, %v650_v29 }
 0x59a   :  { %v653_v32 = vmul.f32 0.0625, %v652_v31 }
 0x59c   :  { %v654_v33 = vsub.f32 %v644_v23, %v653_v32  ;;  %v655_v34 = vsub.f32 %v645_v24, %v653_v32 }
 0x59e   :  { %v656_v35 = vmul.f32 %v654_v33, %v654_v33  ;;  %v657_v36 = vmul.f32 %v655_v34, %v655_v34 }
 0x5a0   :  { %v658_v37 = vadd.f32 %v657_v36, %v656_v35 }
 0x5a2   :  { %v659_v38 = vrot.slane %v658_v37, 4 }
 0x5a4   :  { %v660_v39 = vadd.f32 %v659_v38, %v658_v37 }
 0x5a6   :  { %v661_v40 = vrot.slane %v660_v39, 2 }
 0x5a8   :  { %v662_v41 = vadd.f32 %v661_v40, %v660_v39 }
 0x5aa   :  { %v663_v42 = vrot.slane %v662_v41, 1 }
 0x5ac   :  { %v664_v43 = vadd.f32 %v663_v42, %v662_v41 }
 0x5ae   :  { %v665_v44 = vmul.f32 0.0625, %v664_v43 }
 0x5b0   :  { %v667_v45 = vadd.f32 1e-05, %v665_v44 }
 0x5b2   :  { %1185 = vrsqrt.f32 %v667_v45 }
 0x5bc   :  { %v1186_v47 = vpop.eup %1185 }
 0x5bd   :  { %v669_v48 = vmul.f32 %v1186_v47, %v666_v46 }
 0x5bf   :  { %v671_v50 = vmul.f32 %v669_v48, %v653_v32  ;;  %v677_v51 = vrot.slane %v669_v48, %v1997_v53 }
 0x5c1   :  { %v672_v52 = vsub.f32 %v670_v49, %v671_v50  ;;  %v679_v54 = vmul.f32 %v677_v51, %v644_v23  ;;  %v680_v55 = vmul.f32 %v677_v51, %v645_v24 }
 0x5c3   :  { %v685_v56 = vrot.slane %v672_v52, %v1997_v53 }
 0x5c5   :  { %v687_v57 = vadd.f32 %v685_v56, %v679_v54  ;;  %v688_v58 = vadd.f32 %v685_v56, %v680_v55 }
 0x5c6   :  { %1629 = dma.done.wait [#allocation4], 1024 }
 0x5c7   :  { %1630 = vsyncadd [#allocation4], 4294966272  ;;  %v723_v59 = vld [vmem:[%s2185_s19] sm:$0xff]  ;;  %v725_v60 = vld [vmem:[%s2185_s19 + $0x8] sm:$0xff] }
 0x5c8   :  { %v727_v61 = vld [vmem:[%s2185_s19 + $0x10] sm:$0xff]  ;;  %724 = vst [vmem:[#allocation3] sm:$0xff] %v723_v59  ;;  %726 = vst [vmem:[#allocation3 + $0x8] sm:$0xff] %v725_v60  ;;  %v729_v62 = vld [vmem:[%s2185_s19 + $0x18] sm:$0xff] }
 0x5c9   :  { %728 = vst [vmem:[#allocation3 + $0x10] sm:$0xff] %v727_v61  ;;  %v731_v63 = vld [vmem:[%s2185_s19 + $0x20] sm:$0xff]  ;;  %v733_v0 = vld [vmem:[%s2185_s19 + $0x28] sm:$0xff]  ;;  %730 = vst [vmem:[#allocation3 + $0x18] sm:$0xff] %v729_v62 }
 0x5ca   :  { %732 = vst [vmem:[#allocation3 + $0x20] sm:$0xff] %v731_v63  ;;  %734 = vst [vmem:[#allocation3 + $0x28] sm:$0xff] %v733_v0  ;;  %v735_v1 = vld [vmem:[%s2185_s19 + $0x30] sm:$0xff]  ;;  %v737_v2 = vld [vmem:[%s2185_s19 + $0x38] sm:$0xff] }
 0x5cb   :  { %736 = vst [vmem:[#allocation3 + $0x30] sm:$0xff] %v735_v1  ;;  %738 = vst [vmem:[#allocation3 + $0x38] sm:$0xff] %v737_v2 }
 0x5cc   :  { %746 = vsyncadd [#allocation4 + $0x1], 1024  ;;  %1120 = vmatprep.subr.bf16.mxu0 %v1650_v10  ;;  %v747_v3 = vld [vmem:[#allocation2] sm:$0xff]  ;;  %1136 = vmatprep.mubr.msk.bf16.mxu0 %vm1651_vm0, %v1650_v10  ;;  %v748_v4 = vld [vmem:[#allocation2 + $0x8] sm:$0xff]  ;;  %v755_v12 = vpack.c.bf16 %v688_v58, %v687_v57 }
 0x5cd   :  { %1121 = vmatpush3.bf16.msra.mxu0 %v747_v3  ;;  %v749_v5 = vld [vmem:[#allocation2 + $0x10] sm:$0xff]  ;;  %v750_v6 = vld [vmem:[#allocation2 + $0x18] sm:$0xff]  ;;  %v751_v7 = vld [vmem:[#allocation2 + $0x20] sm:$0xff] }
 0x5ce   :  { %1122 = vmatprep.subr.bf16.mxu0 %v1650_v10  ;;  %v752_v8 = vld [vmem:[#allocation2 + $0x28] sm:$0xff]  ;;  %v753_v9 = vld [vmem:[#allocation2 + $0x30] sm:$0xff]  ;;  %v754_v11 = vld [vmem:[#allocation2 + $0x38] sm:$0xff] }
 0x5cf   :  { %v982_v13 = vld [vmem:[#allocation20] ss:$0 sm:$0xff]  ;;  %v826_v43 = vld [vmem:[#allocation22] sm:$0x1]  ;;  %v830_v46 = vld [vmem:[#allocation23] sm:$0x1] }
 0x5d1   :  { %1123 = vmatpush3.bf16.msra.mxu0 %v748_v4 }
 0x5d2   :  { %1124 = vmatprep.subr.bf16.mxu0 %v1650_v10 }
 0x5d5   :  { %1125 = vmatpush3.bf16.msra.mxu0 %v749_v5 }
 0x5d6   :  { %1126 = vmatprep.subr.bf16.mxu0 %v1650_v10 }
 0x5d9   :  { %1127 = vmatpush3.bf16.msra.mxu0 %v750_v6 }
 0x5da   :  { %1128 = vmatprep.subr.bf16.mxu0 %v1650_v10 }
 0x5dd   :  { %1129 = vmatpush3.bf16.msra.mxu0 %v751_v7 }
 0x5de   :  { %1130 = vmatprep.subr.bf16.mxu0 %v1650_v10 }
 0x5e1   :  { %1131 = vmatpush3.bf16.msra.mxu0 %v752_v8 }
 0x5e2   :  { %1132 = vmatprep.subr.bf16.mxu0 %v1650_v10 }
 0x5e5   :  { %1133 = vmatpush3.bf16.msra.mxu0 %v753_v9 }
 0x5e6   :  { %1134 = vmatprep.subr.bf16.mxu0 %v1650_v10 }
 0x5e9   :  { %1135 = vmatpush3.bf16.msra.mxu0 %v754_v11 }
 0x5ec   :  { %1137 = vmatmul.mubr.bf16.vlgmr.msra.gmra.mrb[8].mxu0 %v755_v12 }
 0x6bf   :  { %v797_v14 = vpop.f32.mrb[8].mxu0 }
 0x6c0   :  { %v798_v15 = vadd.f32 %v982_v13, %v797_v14  ;;  %v1138_v16 = vpop.f32.mrb[9].mxu0 }
 0x6c1   :  { %v800_v17 = vpop.f32.mrb[10].mxu0 }
 0x6c2   :  { %v801_v18 = vadd.f32 %v982_v13, %v800_v17  ;;  %v1139_v19 = vpop.f32.mrb[11].mxu0  ;;  %v804_v20 = vmax.f32 %v798_v15, 0.0 }
 0x6c4   :  { %v805_v21 = vmax.f32 %v801_v18, 0.0 }
 0x6c6   :  { %v806_v22 = vadd.f32 %v805_v21, %v804_v20 }
 0x6c8   :  { %v807_v23 = vrot.slane %v806_v22, 4 }
 0x6ca   :  { %v808_v24 = vadd.f32 %v807_v23, %v806_v22 }
 0x6cc   :  { %v809_v25 = vrot.slane %v808_v24, 2 }
 0x6ce   :  { %v810_v26 = vadd.f32 %v809_v25, %v808_v24 }
 0x6d0   :  { %v811_v27 = vrot.slane %v810_v26, 1 }
 0x6d2   :  { %v812_v28 = vadd.f32 %v811_v27, %v810_v26 }
 0x6d4   :  { %v813_v29 = vmul.f32 0.0625, %v812_v28 }
 0x6d6   :  { %v814_v30 = vsub.f32 %v804_v20, %v813_v29  ;;  %v815_v31 = vsub.f32 %v805_v21, %v813_v29 }
 0x6d8   :  { %v816_v32 = vmul.f32 %v814_v30, %v814_v30  ;;  %v817_v33 = vmul.f32 %v815_v31, %v815_v31 }
 0x6da   :  { %v818_v34 = vadd.f32 %v817_v33, %v816_v32 }
 0x6dc   :  { %v819_v35 = vrot.slane %v818_v34, 4 }
 0x6de   :  { %v820_v36 = vadd.f32 %v819_v35, %v818_v34 }
 0x6e0   :  { %v821_v37 = vrot.slane %v820_v36, 2 }
 0x6e2   :  { %v822_v38 = vadd.f32 %v821_v37, %v820_v36 }
 0x6e4   :  { %v823_v39 = vrot.slane %v822_v38, 1 }
 0x6e6   :  { %v824_v40 = vadd.f32 %v823_v39, %v822_v38 }
 0x6e8   :  { %v825_v41 = vmul.f32 0.0625, %v824_v40 }
 0x6ea   :  { %v827_v42 = vadd.f32 1e-05, %v825_v41 }
 0x6ec   :  { %1187 = vrsqrt.f32 %v827_v42 }
 0x6f6   :  { %v1188_v44 = vpop.eup %1187 }
 0x6f7   :  { %v829_v45 = vmul.f32 %v1188_v44, %v826_v43 }
 0x6f9   :  { %v831_v47 = vmul.f32 %v829_v45, %v813_v29  ;;  %v837_v48 = vrot.slane %v829_v45, %v1997_v53 }
 0x6fb   :  { %v832_v49 = vsub.f32 %v830_v46, %v831_v47  ;;  %v839_v50 = vmul.f32 %v837_v48, %v804_v20  ;;  %v840_v51 = vmul.f32 %v837_v48, %v805_v21 }
 0x6fd   :  { %v845_v52 = vrot.slane %v832_v49, %v1997_v53 }
 0x6ff   :  { %v847_v54 = vadd.f32 %v845_v52, %v839_v50  ;;  %v848_v55 = vadd.f32 %v845_v52, %v840_v51 }
 0x700   :  { %1631 = dma.done.wait [#allocation4 + $0x1], 1024 }
 0x701   :  { %1632 = vsyncadd [#allocation4 + $0x1], 4294966272  ;;  %1140 = vmatprep.subr.bf16.mxu1 %v1650_v10  ;;  %1156 = vmatprep.mubr.msk.bf16.mxu1 %vm1651_vm0, %v1650_v10  ;;  %v851_v56 = vld [vmem:[#allocation3] sm:$0xff]  ;;  %v852_v57 = vld [vmem:[#allocation3 + $0x8] sm:$0xff]  ;;  %v859_v63 = vpack.c.bf16 %v848_v55, %v847_v54  ;;  %s1654_s19 = smov [#allocation27]  }
 0x702   :  { %1141 = vmatpush3.bf16.msra.mxu1 %v851_v56  ;;  %v853_v58 = vld [vmem:[#allocation3 + $0x10] sm:$0xff]  ;;  %v854_v53 = vld [vmem:[#allocation3 + $0x18] sm:$0xff]  ;;  %v855_v59 = vld [vmem:[#allocation3 + $0x20] sm:$0xff]  ;;  %s927_s3 = sshll.u32 %s1654_s19, 4  ;;  %s928_s3 = int_to_ptr.vmem [resolvable:$true] %s927_s3 }
 0x703   :  { %1142 = vmatprep.subr.bf16.mxu1 %v1650_v10  ;;  %v856_v60 = vld [vmem:[#allocation3 + $0x28] sm:$0xff]  ;;  %v857_v61 = vld [vmem:[#allocation3 + $0x30] sm:$0xff]  ;;  %v858_v62 = vld [vmem:[#allocation3 + $0x38] sm:$0xff]  ;;  %s1563_s14 = scalar_lea.vmem %s928_s3, 256  ;;  %p1568_p1 = scmp.lt.s32.totalorder %s928_s3, %s928_s3 }
 0x704   :  { %p1564_p0 = scmp.ne.s32.totalorder %s928_s3, %s1563_s14  ;;  %p1569_p2 = scmp.lt.s32.totalorder %s1563_s14, %s1563_s14 }
 0x706   :  { %1143 = vmatpush3.bf16.msra.mxu1 %v852_v57  ;;  %p1570_p3 = por %p1569_p2, %p1568_p1 }
 0x707   :  { %1144 = vmatprep.subr.bf16.mxu1 %v1650_v10 }
 0x708   :  { %p1571_p4 = pnand %p1570_p3, %p1564_p0 }
 0x70a   :  { %1145 = vmatpush3.bf16.msra.mxu1 %v853_v58 }
 0x70b   :  { %1146 = vmatprep.subr.bf16.mxu1 %v1650_v10 }
 0x70e   :  { %1147 = vmatpush3.bf16.msra.mxu1 %v854_v53 }
 0x70f   :  { %1148 = vmatprep.subr.bf16.mxu1 %v1650_v10 }
 0x712   :  { %1149 = vmatpush3.bf16.msra.mxu1 %v855_v59 }
 0x713   :  { %1150 = vmatprep.subr.bf16.mxu1 %v1650_v10 }
 0x716   :  { %1151 = vmatpush3.bf16.msra.mxu1 %v856_v60 }
 0x717   :  { %1152 = vmatprep.subr.bf16.mxu1 %v1650_v10 }
 0x71a   :  { %1153 = vmatpush3.bf16.msra.mxu1 %v857_v61 }
 0x71b   :  { %1154 = vmatprep.subr.bf16.mxu1 %v1650_v10 }
 0x71e   :  { %1155 = vmatpush3.bf16.msra.mxu1 %v858_v62 }
 0x721   :  { %1157 = vmatmul.mubr.bf16.vlgmr.msra.gmra.mrb[8].mxu1 %v859_v63 }
 0x722   :  { %1574 = shalt.err (!%p1571_p4)
}
 0x723   :  { %s1575_s7 = scalar_lea.hbm %s2188_s22, 256 }
 0x724   :  { %p1576_p5 = scmp.ne.s32.totalorder %s2188_s22, %s1575_s7  ;;  %p1579_p6 = scmp.lt.u32.totalorder %s1575_s7, %s2188_s22 }
 0x726   :  { %p1581_p7 = pnand %p1579_p6, %p1576_p5 }
 0x728   :  { %1584 = shalt.err (!%p1581_p7)
}
 0x729   :  { %s1655_s29 = smov 128   ;;  %s1656_s1 = smov 8   ;;  %v983_v10 = vld [vmem:[#allocation25] ss:$0 sm:$0xff] }
 0x72a   :  { %933 = dma.vmem_to_hbm [thread:$0]  %s928_s3, 256, %s2188_s22, [#allocation28], %s1655_s29, %s1655_s29, %s1656_s1  }
 0x72b   :  { %s1657_s5 = smov [#allocation26]  }
 0x72c   :  { %s915_s12 = sshll.u32 %s1657_s5, 4  ;;  %s916_s12 = int_to_ptr.vmem [resolvable:$true] %s915_s12 }
 0x72d   :  { %s1585_s18 = scalar_lea.vmem %s916_s12, 256  ;;  %p1590_p9 = scmp.lt.s32.totalorder %s916_s12, %s916_s12 }
 0x72e   :  { %p1586_p8 = scmp.ne.s32.totalorder %s916_s12, %s1585_s18  ;;  %p1591_p10 = scmp.lt.s32.totalorder %s1585_s18, %s1585_s18 }
 0x730   :  { %p1592_p11 = por %p1591_p10, %p1590_p9 }
 0x732   :  { %p1593_p12 = pnand %p1592_p11, %p1586_p8 }
 0x7f4   :  { %v901_v0 = vpop.f32.mrb[8].mxu1 }
 0x7f5   :  { %v902_v1 = vadd.f32 %v983_v10, %v901_v0  ;;  %v1158_v2 = vpop.f32.mrb[9].mxu1 }
 0x7f6   :  { %v904_v3 = vpop.f32.mrb[10].mxu1 }
 0x7f7   :  { %908 = vst [vmem:[#allocation26] sm:$0xff] %v902_v1  ;;  %v905_v4 = vadd.f32 %v983_v10, %v904_v3  ;;  %v1159_v5 = vpop.f32.mrb[11].mxu1 }
 0x7f9   :  { %909 = vst [vmem:[#allocation26 + $0x8] sm:$0xff] %v905_v4 }
 0x7fa   :  { %1596 = shalt.err (!%p1593_p12)
}
 0x7fb   :  { %s1597_s17 = scalar_lea.hbm %s2187_s21, 256 }
 0x7fc   :  { %p1598_p13 = scmp.ne.s32.totalorder %s2187_s21, %s1597_s17  ;;  %p1601_p0 = scmp.lt.u32.totalorder %s1597_s17, %s2187_s21 }
 0x7fe   :  { %p1603_p1 = pnand %p1601_p0, %p1598_p13 }
 0x800   :  { %1606 = shalt.err (!%p1603_p1)
}
 0x801   :  { %921 = dma.vmem_to_hbm [thread:$0]  %s916_s12, 256, %s2187_s21, [#allocation7], %s1655_s29, %s1655_s29, %s1656_s1  }
 0x802   :  { %1633 = dma.done.wait [#allocation7], 256  }
 0x803   :  { %1634 = vsyncadd [#allocation7], 4294967040 }
 0x804   :  { %1635 = dma.done.wait [#allocation28], 256  }
 0x805   :  { %1636 = vsyncadd [#allocation28], 4294967040 }
 0x806   :  { %940 = vsyncpa [#allocation6], 1 }
 0x807   :  { %941 = vsyncpa [#allocation9], 1 }
 0x808   :  { %942 = vsyncpa [#allocation12], 1 }
 0x809   :  { %943 = vsyncpa [#allocation15], 1 }
 0x80a   :  { %944 = vsyncpa [#allocation18], 1 }
 0x80b   :  { %945 = vsyncpa [#allocation21], 1 }
 0x80c   :  { %946 = vsyncpa [#allocation24], 1 }
 0x80d   :  { %947 = vsyncpa [#allocation7], 1 }
 0x80e   :  { %948 = vsyncpa [#allocation28], 1 }
 0x80f   :  { %949 = vsyncmov [#allocation4] }
 0x812   :  { %s950_s20 = vpop.sfrf %949 }
 0x813   :  { %p984_p2 = scmp.ne.s32.totalorder %s950_s20, 0 }
 0x815   :  { %954 = shalt.err (%p984_p2)  }
 0x816   :  { %956 = vsyncmov [#allocation4 + $0x1] }
 0x819   :  { %s957_s28 = vpop.sfrf %956 }
 0x81a   :  { %p985_p3 = scmp.ne.s32.totalorder %s957_s28, 0 }
 0x81c   :  { %961 = shalt.err (%p985_p3)  }

</bundles_post_ra>
